<compile_context>
chip_gen: v7x
topology: tpu7x:2x2x1
jax: 0.10.0
libtpu: 0.0.40
codegen_flags: <defaults>
</compile_context>

<pallas_src>
import functools

import jax
import jax.numpy as jnp
from jax import lax
from jax.experimental import pallas as pl
from jax.experimental.pallas import tpu as pltpu


def _lstm_kernel(num_layers, hidden_size, seq_len, batch, *refs):
    # refs = (x_ref,
    #         [w_ih_0, w_hh_0, b_0, ..., w_ih_{L-1}, w_hh_{L-1}, b_{L-1}],
    #         w_fc_ref, b_fc_ref,
    #         out_ref,
    #         gates_ref, seq_ref)                     # scratch
    x_ref = refs[0]
    layer_refs = refs[1:1 + 3 * num_layers]
    w_fc_ref, b_fc_ref, out_ref, gates_ref, seq_ref = refs[1 + 3 * num_layers:]

    T, B, H = seq_len, batch, hidden_size

    h_last = jnp.zeros((B, H), jnp.float32)
    for l in range(num_layers):
        w_ih = layer_refs[3 * l][...]      # (in_features, 4H)
        w_hh = layer_refs[3 * l + 1][...]  # (H, 4H)
        b = layer_refs[3 * l + 2][...]     # (1, 4H)  (b_ih + b_hh, pre-summed)

        # --- batched (non-recurrent) half: all T timesteps in one MXU matmul ---
        layer_in = x_ref[...] if l == 0 else seq_ref[...]          # (T*B, in)
        gates_ref[...] = (jnp.dot(layer_in, w_ih,
                                  preferred_element_type=jnp.float32) + b)

        # --- serial recurrence: one (B,H)x(H,4H) matmul per step ---
        def step(t, carry, l=l, w_hh=w_hh):
            h, c = carry
            row = pl.multiple_of(t * B, 8)                         # B is padded to 8
            g = gates_ref[pl.ds(row, B), :] + jnp.dot(
                h, w_hh, preferred_element_type=jnp.float32)       # (B, 4H)
            sg = jax.nn.sigmoid(g)                                 # one EUP pass
            th = jnp.tanh(g)                                       # one EUP pass
            i_g = sg[:, 0 * H:1 * H]
            f_g = sg[:, 1 * H:2 * H]
            g_g = th[:, 2 * H:3 * H]
            o_g = sg[:, 3 * H:4 * H]
            c_new = f_g * c + i_g * g_g
            h_new = o_g * jnp.tanh(c_new)
            if l < num_layers - 1:
                # Only intermediate layers feed a next layer.
                seq_ref[pl.ds(row, B), :] = h_new
            return (h_new, c_new)

        h0 = jnp.zeros((B, H), jnp.float32)
        c0 = jnp.zeros((B, H), jnp.float32)
        h_last, _ = lax.fori_loop(0, T, step, (h0, c0), unroll=True)

    # Final Linear on the top layer's last-timestep hidden state.
    out_ref[...] = (jnp.dot(h_last, w_fc_ref[...],
                            preferred_element_type=jnp.float32)
                    + b_fc_ref[...]).astype(out_ref.dtype)


def prepare_params(layer_params, w_fc, b_fc):
    """One-time parameter prep (transposes + bias folding) off the inference path.

    layer_params: list of (w_ih (4H,in), w_hh (4H,H), b_ih (4H,), b_hh (4H,))
    w_fc: (O, H), b_fc: (O,)
    """
    prepped = []
    for (w_ih, w_hh, b_ih, b_hh) in layer_params:
        prepped.append(jnp.transpose(jnp.asarray(w_ih, jnp.float32)))   # (in, 4H)
        prepped.append(jnp.transpose(jnp.asarray(w_hh, jnp.float32)))   # (H, 4H)
        prepped.append((jnp.asarray(b_ih, jnp.float32)
                        + jnp.asarray(b_hh, jnp.float32))[None, :])     # (1, 4H)
    prepped.append(jnp.transpose(jnp.asarray(w_fc, jnp.float32)))       # (H, O)
    prepped.append(jnp.asarray(b_fc, jnp.float32)[None, :])             # (1, O)
    return prepped


@jax.jit
def lstm_fault_predictor(x, prepped_params):
    """x: (B, T, I) batch_first float32, prepped_params from prepare_params()."""
    B, T, I = x.shape
    num_layers = (len(prepped_params) - 2) // 3
    H = prepped_params[1].shape[0]      # w_hh is (H, 4H)
    O = prepped_params[-2].shape[1]     # w_fc is (H, O)

    # Pad batch to a full sublane tile so every (B, .) op is unmasked.
    B_pad = max(8, ((B + 7) // 8) * 8)
    x_tm = jnp.transpose(x.astype(jnp.float32), (1, 0, 2))              # (T, B, I)
    if B_pad != B:
        x_tm = jnp.pad(x_tm, ((0, 0), (0, B_pad - B), (0, 0)))
    x2d = x_tm.reshape(T * B_pad, I)                                    # (T*B, I)

    vmem_spec = pl.BlockSpec(memory_space=pltpu.MemorySpace.VMEM)
    kernel = functools.partial(_lstm_kernel, num_layers, H, T, B_pad)

    # TODO(synk): for large B on v7x, add a batch-tile grid axis with
    # dimension_semantics=("parallel",) so both TensorCores are used.
    out = pl.pallas_call(
        kernel,
        out_shape=jax.ShapeDtypeStruct((B_pad, O), jnp.float32),
        in_specs=[vmem_spec] * (1 + len(prepped_params)),
        out_specs=vmem_spec,
        scratch_shapes=[
            pltpu.VMEM((T * B_pad, 4 * H), jnp.float32),   # per-layer gate precompute
            pltpu.VMEM((T * B_pad, H), jnp.float32),       # inter-layer hidden states
        ],
        compiler_params=pltpu.CompilerParams(
            vmem_limit_bytes=32 * 1024 * 1024),
    )(x2d, *prepped_params)
    return out[:B]


def lstm_fault_predictor_ref(x, layer_params, w_fc, b_fc):
    """Pure-JAX reference matching PyTorch nn.LSTM(batch_first=True) + nn.Linear."""
    B, T, _ = x.shape
    inp = x
    for (w_ih, w_hh, b_ih, b_hh) in layer_params:
        H = w_hh.shape[1]
        h = jnp.zeros((B, H), jnp.float32)
        c = jnp.zeros((B, H), jnp.float32)
        outs = []
        for t in range(T):
            gates = inp[:, t, :] @ w_ih.T + h @ w_hh.T + b_ih + b_hh
            i_g = jax.nn.sigmoid(gates[:, 0 * H:1 * H])
            f_g = jax.nn.sigmoid(gates[:, 1 * H:2 * H])
            g_g = jnp.tanh(gates[:, 2 * H:3 * H])
            o_g = jax.nn.sigmoid(gates[:, 3 * H:4 * H])
            c = f_g * c + i_g * g_g
            h = o_g * jnp.tanh(c)
            outs.append(h)
        inp = jnp.stack(outs, axis=1)
    return inp[:, -1, :] @ w_fc.T + b_fc


if __name__ == "__main__":
    # Small shapes consistent with the module's forward: (batch, seq, features).
    B, T = 2, 8
    input_size, hidden_size, num_layers, output_size = 4, 32, 2, 3

    key = jax.random.PRNGKey(0)
    keys = iter(jax.random.split(key, 4 * num_layers + 3))
    scale = 1.0 / jnp.sqrt(hidden_size)

    layer_params = []
    for l in range(num_layers):
        in_feat = input_size if l == 0 else hidden_size
        w_ih = jax.random.uniform(next(keys), (4 * hidden_size, in_feat),
                                  minval=-scale, maxval=scale, dtype=jnp.float32)
        w_hh = jax.random.uniform(next(keys), (4 * hidden_size, hidden_size),
                                  minval=-scale, maxval=scale, dtype=jnp.float32)
        b_ih = jax.random.uniform(next(keys), (4 * hidden_size,),
                                  minval=-scale, maxval=scale, dtype=jnp.float32)
        b_hh = jax.random.uniform(next(keys), (4 * hidden_size,),
                                  minval=-scale, maxval=scale, dtype=jnp.float32)
        layer_params.append((w_ih, w_hh, b_ih, b_hh))

    w_fc = jax.random.uniform(next(keys), (output_size, hidden_size),
                              minval=-scale, maxval=scale, dtype=jnp.float32)
    b_fc = jax.random.uniform(next(keys), (output_size,),
                              minval=-scale, maxval=scale, dtype=jnp.float32)

    x = jax.random.normal(next(keys), (B, T, input_size), dtype=jnp.float32)

    prepped = prepare_params(layer_params, w_fc, b_fc)   # one-time prep
    out = lstm_fault_predictor(x, prepped)
    out = jax.block_until_ready(out)

    ref = lstm_fault_predictor_ref(x, layer_params, w_fc, b_fc)
    assert out.shape == (B, output_size)
    assert jnp.allclose(out, ref, rtol=1e-4, atol=1e-5), (out, ref)
    print("KERNEL_OK")
</pallas_src>

<mosaic_0001>
module attributes {stable_mosaic.version = 11 : i64} {
  func.func @_lstm_kernel(%arg0: memref<64x4xf32, #tpu.memory_space<vmem>>, %arg1: memref<4x128xf32, #tpu.memory_space<vmem>>, %arg2: memref<32x128xf32, #tpu.memory_space<vmem>>, %arg3: memref<1x128xf32, #tpu.memory_space<vmem>>, %arg4: memref<32x128xf32, #tpu.memory_space<vmem>>, %arg5: memref<32x128xf32, #tpu.memory_space<vmem>>, %arg6: memref<1x128xf32, #tpu.memory_space<vmem>>, %arg7: memref<32x3xf32, #tpu.memory_space<vmem>>, %arg8: memref<1x3xf32, #tpu.memory_space<vmem>>, %arg9: memref<8x3xf32, #tpu.memory_space<vmem>>, %arg10: memref<64x128xf32, #tpu.memory_space<vmem>>, %arg11: memref<64x32xf32, #tpu.memory_space<vmem>>) attributes {dimension_semantics = [], scalar_prefetch = 0 : i64, scratch_operands = 2 : i64, tpu.core_type = #tpu.core_type<tc>} {
    %c0 = arith.constant 0 : index
    %c0_0 = arith.constant 0 : index
    %0 = vector.load %arg1[%c0, %c0_0] : memref<4x128xf32, #tpu.memory_space<vmem>>, vector<4x128xf32>
    %c0_1 = arith.constant 0 : index
    %c0_2 = arith.constant 0 : index
    %1 = vector.load %arg2[%c0_1, %c0_2] : memref<32x128xf32, #tpu.memory_space<vmem>>, vector<32x128xf32>
    %c0_3 = arith.constant 0 : index
    %c0_4 = arith.constant 0 : index
    %2 = vector.load %arg3[%c0_3, %c0_4] : memref<1x128xf32, #tpu.memory_space<vmem>>, vector<1x128xf32>
    %c0_5 = arith.constant 0 : index
    %c0_6 = arith.constant 0 : index
    %3 = vector.load %arg0[%c0_5, %c0_6] : memref<64x4xf32, #tpu.memory_space<vmem>>, vector<64x4xf32>
    %cst = arith.constant dense<0.000000e+00> : vector<64x128xf32>
    %4 = tpu.matmul %3, %0, %cst {dimension_numbers = #tpu.dot_dimension_numbers<[1], [0], [0], [1], [0, 0, 1, 1], [], []>} : vector<64x4xf32>, vector<4x128xf32>, vector<64x128xf32> -> vector<64x128xf32>
    %5 = vector.broadcast %2 : vector<1x128xf32> to vector<64x128xf32>
    %6 = arith.addf %4, %5 : vector<64x128xf32>
    %c0_7 = arith.constant 0 : index
    %c0_8 = arith.constant 0 : index
    %7 = vector.load %arg10[%c0_7, %c0_8] : memref<64x128xf32, #tpu.memory_space<vmem>>, vector<64x128xf32>
    tpu.vector_store %arg10[%c0_7, %c0_8], %6 {strides = array<i32>} : memref<64x128xf32, #tpu.memory_space<vmem>>, vector<64x128xf32>,
    %cst_9 = arith.constant 0.000000e+00 : f32
    %8 = vector.broadcast %cst_9 : f32 to vector<8x32xf32>
    %cst_10 = arith.constant 0.000000e+00 : f32
    %9 = vector.broadcast %cst_10 : f32 to vector<8x32xf32>
    %c0_i32 = arith.constant 0 : i32
    %c8_i32 = arith.constant 8 : i32
    %10 = arith.muli %c0_i32, %c8_i32 : i32
    %11 = tpu.assume_multiple %10, 8 : i32
    %12 = arith.index_cast %11 : i32 to index
    %c0_11 = arith.constant 0 : index
    %13 = vector.load %arg10[%12, %c0_11] : memref<64x128xf32, #tpu.memory_space<vmem>>, vector<8x128xf32>
    %cst_12 = arith.constant dense<0.000000e+00> : vector<8x128xf32>
    %14 = tpu.matmul %8, %1, %cst_12 {dimension_numbers = #tpu.dot_dimension_numbers<[1], [0], [0], [1], [0, 0, 1, 1], [], []>} : vector<8x32xf32>, vector<32x128xf32>, vector<8x128xf32> -> vector<8x128xf32>
    %15 = arith.addf %13, %14 : vector<8x128xf32>
    %16 = arith.negf %15 : vector<8x128xf32>
    %17 = math.exp %16 : vector<8x128xf32>
    %cst_13 = arith.constant 1.000000e+00 : f32
    %18 = vector.broadcast %cst_13 : f32 to vector<8x128xf32>
    %19 = arith.addf %18, %17 : vector<8x128xf32>
    %20 = arith.divf %18, %19 : vector<8x128xf32>
    %21 = math.tanh %15 : vector<8x128xf32>
    %22 = vector.extract_strided_slice %20 {offsets = [0, 0], sizes = [8, 32], strides = [1, 1]} : vector<8x128xf32> to vector<8x32xf32>
    %23 = vector.extract_strided_slice %20 {offsets = [0, 32], sizes = [8, 32], strides = [1, 1]} : vector<8x128xf32> to vector<8x32xf32>
    %24 = vector.extract_strided_slice %21 {offsets = [0, 64], sizes = [8, 32], strides = [1, 1]} : vector<8x128xf32> to vector<8x32xf32>
    %25 = vector.extract_strided_slice %20 {offsets = [0, 96], sizes = [8, 32], strides = [1, 1]} : vector<8x128xf32> to vector<8x32xf32>
    %26 = arith.mulf %23, %9 : vector<8x32xf32>
    %27 = arith.mulf %22, %24 : vector<8x32xf32>
    %28 = arith.addf %26, %27 : vector<8x32xf32>
    %29 = math.tanh %28 : vector<8x32xf32>
    %30 = arith.mulf %25, %29 : vector<8x32xf32>
    %31 = arith.index_cast %11 : i32 to index
    %c0_14 = arith.constant 0 : index
    %32 = vector.load %arg11[%31, %c0_14] : memref<64x32xf32, #tpu.memory_space<vmem>>, vector<8x32xf32>
    tpu.vector_store %arg11[%31, %c0_14], %30 {strides = array<i32>} : memref<64x32xf32, #tpu.memory_space<vmem>>, vector<8x32xf32>,
    %c1_i32 = arith.constant 1 : i32
    %c8_i32_15 = arith.constant 8 : i32
    %33 = arith.muli %c1_i32, %c8_i32_15 : i32
    %34 = tpu.assume_multiple %33, 8 : i32
    %35 = arith.index_cast %34 : i32 to index
    %c0_16 = arith.constant 0 : index
    %36 = vector.load %arg10[%35, %c0_16] : memref<64x128xf32, #tpu.memory_space<vmem>>, vector<8x128xf32>
    %cst_17 = arith.constant dense<0.000000e+00> : vector<8x128xf32>
    %37 = tpu.matmul %30, %1, %cst_17 {dimension_numbers = #tpu.dot_dimension_numbers<[1], [0], [0], [1], [0, 0, 1, 1], [], []>} : vector<8x32xf32>, vector<32x128xf32>, vector<8x128xf32> -> vector<8x128xf32>
    %38 = arith.addf %36, %37 : vector<8x128xf32>
    %39 = arith.negf %38 : vector<8x128xf32>
    %40 = math.exp %39 : vector<8x128xf32>
    %cst_18 = arith.constant 1.000000e+00 : f32
    %41 = vector.broadcast %cst_18 : f32 to vector<8x128xf32>
    %42 = arith.addf %41, %40 : vector<8x128xf32>
    %43 = arith.divf %41, %42 : vector<8x128xf32>
    %44 = math.tanh %38 : vector<8x128xf32>
    %45 = vector.extract_strided_slice %43 {offsets = [0, 0], sizes = [8, 32], strides = [1, 1]} : vector<8x128xf32> to vector<8x32xf32>
    %46 = vector.extract_strided_slice %43 {offsets = [0, 32], sizes = [8, 32], strides = [1, 1]} : vector<8x128xf32> to vector<8x32xf32>
    %47 = vector.extract_strided_slice %44 {offsets = [0, 64], sizes = [8, 32], strides = [1, 1]} : vector<8x128xf32> to vector<8x32xf32>
    %48 = vector.extract_strided_slice %43 {offsets = [0, 96], sizes = [8, 32], strides = [1, 1]} : vector<8x128xf32> to vector<8x32xf32>
    %49 = arith.mulf %46, %28 : vector<8x32xf32>
    %50 = arith.mulf %45, %47 : vector<8x32xf32>
    %51 = arith.addf %49, %50 : vector<8x32xf32>
    %52 = math.tanh %51 : vector<8x32xf32>
    %53 = arith.mulf %48, %52 : vector<8x32xf32>
    %54 = arith.index_cast %34 : i32 to index
    %c0_19 = arith.constant 0 : index
    %55 = vector.load %arg11[%54, %c0_19] : memref<64x32xf32, #tpu.memory_space<vmem>>, vector<8x32xf32>
    tpu.vector_store %arg11[%54, %c0_19], %53 {strides = array<i32>} : memref<64x32xf32, #tpu.memory_space<vmem>>, vector<8x32xf32>,
    %c2_i32 = arith.constant 2 : i32
    %c8_i32_20 = arith.constant 8 : i32
    %56 = arith.muli %c2_i32, %c8_i32_20 : i32
    %57 = tpu.assume_multiple %56, 8 : i32
    %58 = arith.index_cast %57 : i32 to index
    %c0_21 = arith.constant 0 : index
    %59 = vector.load %arg10[%58, %c0_21] : memref<64x128xf32, #tpu.memory_space<vmem>>, vector<8x128xf32>
    %cst_22 = arith.constant dense<0.000000e+00> : vector<8x128xf32>
    %60 = tpu.matmul %53, %1, %cst_22 {dimension_numbers = #tpu.dot_dimension_numbers<[1], [0], [0], [1], [0, 0, 1, 1], [], []>} : vector<8x32xf32>, vector<32x128xf32>, vector<8x128xf32> -> vector<8x128xf32>
    %61 = arith.addf %59, %60 : vector<8x128xf32>
    %62 = arith.negf %61 : vector<8x128xf32>
    %63 = math.exp %62 : vector<8x128xf32>
    %cst_23 = arith.constant 1.000000e+00 : f32
    %64 = vector.broadcast %cst_23 : f32 to vector<8x128xf32>
    %65 = arith.addf %64, %63 : vector<8x128xf32>
    %66 = arith.divf %64, %65 : vector<8x128xf32>
    %67 = math.tanh %61 : vector<8x128xf32>
    %68 = vector.extract_strided_slice %66 {offsets = [0, 0], sizes = [8, 32], strides = [1, 1]} : vector<8x128xf32> to vector<8x32xf32>
    %69 = vector.extract_strided_slice %66 {offsets = [0, 32], sizes = [8, 32], strides = [1, 1]} : vector<8x128xf32> to vector<8x32xf32>
    %70 = vector.extract_strided_slice %67 {offsets = [0, 64], sizes = [8, 32], strides = [1, 1]} : vector<8x128xf32> to vector<8x32xf32>
    %71 = vector.extract_strided_slice %66 {offsets = [0, 96], sizes = [8, 32], strides = [1, 1]} : vector<8x128xf32> to vector<8x32xf32>
    %72 = arith.mulf %69, %51 : vector<8x32xf32>
    %73 = arith.mulf %68, %70 : vector<8x32xf32>
    %74 = arith.addf %72, %73 : vector<8x32xf32>
    %75 = math.tanh %74 : vector<8x32xf32>
    %76 = arith.mulf %71, %75 : vector<8x32xf32>
    %77 = arith.index_cast %57 : i32 to index
    %c0_24 = arith.constant 0 : index
    %78 = vector.load %arg11[%77, %c0_24] : memref<64x32xf32, #tpu.memory_space<vmem>>, vector<8x32xf32>
    tpu.vector_store %arg11[%77, %c0_24], %76 {strides = array<i32>} : memref<64x32xf32, #tpu.memory_space<vmem>>, vector<8x32xf32>,
    %c3_i32 = arith.constant 3 : i32
    %c8_i32_25 = arith.constant 8 : i32
    %79 = arith.muli %c3_i32, %c8_i32_25 : i32
    %80 = tpu.assume_multiple %79, 8 : i32
    %81 = arith.index_cast %80 : i32 to index
    %c0_26 = arith.constant 0 : index
    %82 = vector.load %arg10[%81, %c0_26] : memref<64x128xf32, #tpu.memory_space<vmem>>, vector<8x128xf32>
    %cst_27 = arith.constant dense<0.000000e+00> : vector<8x128xf32>
    %83 = tpu.matmul %76, %1, %cst_27 {dimension_numbers = #tpu.dot_dimension_numbers<[1], [0], [0], [1], [0, 0, 1, 1], [], []>} : vector<8x32xf32>, vector<32x128xf32>, vector<8x128xf32> -> vector<8x128xf32>
    %84 = arith.addf %82, %83 : vector<8x128xf32>
    %85 = arith.negf %84 : vector<8x128xf32>
    %86 = math.exp %85 : vector<8x128xf32>
    %cst_28 = arith.constant 1.000000e+00 : f32
    %87 = vector.broadcast %cst_28 : f32 to vector<8x128xf32>
    %88 = arith.addf %87, %86 : vector<8x128xf32>
    %89 = arith.divf %87, %88 : vector<8x128xf32>
    %90 = math.tanh %84 : vector<8x128xf32>
    %91 = vector.extract_strided_slice %89 {offsets = [0, 0], sizes = [8, 32], strides = [1, 1]} : vector<8x128xf32> to vector<8x32xf32>
    %92 = vector.extract_strided_slice %89 {offsets = [0, 32], sizes = [8, 32], strides = [1, 1]} : vector<8x128xf32> to vector<8x32xf32>
    %93 = vector.extract_strided_slice %90 {offsets = [0, 64], sizes = [8, 32], strides = [1, 1]} : vector<8x128xf32> to vector<8x32xf32>
    %94 = vector.extract_strided_slice %89 {offsets = [0, 96], sizes = [8, 32], strides = [1, 1]} : vector<8x128xf32> to vector<8x32xf32>
    %95 = arith.mulf %92, %74 : vector<8x32xf32>
    %96 = arith.mulf %91, %93 : vector<8x32xf32>
    %97 = arith.addf %95, %96 : vector<8x32xf32>
    %98 = math.tanh %97 : vector<8x32xf32>
    %99 = arith.mulf %94, %98 : vector<8x32xf32>
    %100 = arith.index_cast %80 : i32 to index
    %c0_29 = arith.constant 0 : index
    %101 = vector.load %arg11[%100, %c0_29] : memref<64x32xf32, #tpu.memory_space<vmem>>, vector<8x32xf32>
    tpu.vector_store %arg11[%100, %c0_29], %99 {strides = array<i32>} : memref<64x32xf32, #tpu.memory_space<vmem>>, vector<8x32xf32>,
    %c4_i32 = arith.constant 4 : i32
    %c8_i32_30 = arith.constant 8 : i32
    %102 = arith.muli %c4_i32, %c8_i32_30 : i32
    %103 = tpu.assume_multiple %102, 8 : i32
    %104 = arith.index_cast %103 : i32 to index
    %c0_31 = arith.constant 0 : index
    %105 = vector.load %arg10[%104, %c0_31] : memref<64x128xf32, #tpu.memory_space<vmem>>, vector<8x128xf32>
    %cst_32 = arith.constant dense<0.000000e+00> : vector<8x128xf32>
    %106 = tpu.matmul %99, %1, %cst_32 {dimension_numbers = #tpu.dot_dimension_numbers<[1], [0], [0], [1], [0, 0, 1, 1], [], []>} : vector<8x32xf32>, vector<32x128xf32>, vector<8x128xf32> -> vector<8x128xf32>
    %107 = arith.addf %105, %106 : vector<8x128xf32>
    %108 = arith.negf %107 : vector<8x128xf32>
    %109 = math.exp %108 : vector<8x128xf32>
    %cst_33 = arith.constant 1.000000e+00 : f32
    %110 = vector.broadcast %cst_33 : f32 to vector<8x128xf32>
    %111 = arith.addf %110, %109 : vector<8x128xf32>
    %112 = arith.divf %110, %111 : vector<8x128xf32>
    %113 = math.tanh %107 : vector<8x128xf32>
    %114 = vector.extract_strided_slice %112 {offsets = [0, 0], sizes = [8, 32], strides = [1, 1]} : vector<8x128xf32> to vector<8x32xf32>
    %115 = vector.extract_strided_slice %112 {offsets = [0, 32], sizes = [8, 32], strides = [1, 1]} : vector<8x128xf32> to vector<8x32xf32>
    %116 = vector.extract_strided_slice %113 {offsets = [0, 64], sizes = [8, 32], strides = [1, 1]} : vector<8x128xf32> to vector<8x32xf32>
    %117 = vector.extract_strided_slice %112 {offsets = [0, 96], sizes = [8, 32], strides = [1, 1]} : vector<8x128xf32> to vector<8x32xf32>
    %118 = arith.mulf %115, %97 : vector<8x32xf32>
    %119 = arith.mulf %114, %116 : vector<8x32xf32>
    %120 = arith.addf %118, %119 : vector<8x32xf32>
    %121 = math.tanh %120 : vector<8x32xf32>
    %122 = arith.mulf %117, %121 : vector<8x32xf32>
    %123 = arith.index_cast %103 : i32 to index
    %c0_34 = arith.constant 0 : index
    %124 = vector.load %arg11[%123, %c0_34] : memref<64x32xf32, #tpu.memory_space<vmem>>, vector<8x32xf32>
    tpu.vector_store %arg11[%123, %c0_34], %122 {strides = array<i32>} : memref<64x32xf32, #tpu.memory_space<vmem>>, vector<8x32xf32>,
    %c5_i32 = arith.constant 5 : i32
    %c8_i32_35 = arith.constant 8 : i32
    %125 = arith.muli %c5_i32, %c8_i32_35 : i32
    %126 = tpu.assume_multiple %125, 8 : i32
    %127 = arith.index_cast %126 : i32 to index
    %c0_36 = arith.constant 0 : index
    %128 = vector.load %arg10[%127, %c0_36] : memref<64x128xf32, #tpu.memory_space<vmem>>, vector<8x128xf32>
    %cst_37 = arith.constant dense<0.000000e+00> : vector<8x128xf32>
    %129 = tpu.matmul %122, %1, %cst_37 {dimension_numbers = #tpu.dot_dimension_numbers<[1], [0], [0], [1], [0, 0, 1, 1], [], []>} : vector<8x32xf32>, vector<32x128xf32>, vector<8x128xf32> -> vector<8x128xf32>
    %130 = arith.addf %128, %129 : vector<8x128xf32>
    %131 = arith.negf %130 : vector<8x128xf32>
    %132 = math.exp %131 : vector<8x128xf32>
    %cst_38 = arith.constant 1.000000e+00 : f32
    %133 = vector.broadcast %cst_38 : f32 to vector<8x128xf32>
    %134 = arith.addf %133, %132 : vector<8x128xf32>
    %135 = arith.divf %133, %134 : vector<8x128xf32>
    %136 = math.tanh %130 : vector<8x128xf32>
    %137 = vector.extract_strided_slice %135 {offsets = [0, 0], sizes = [8, 32], strides = [1, 1]} : vector<8x128xf32> to vector<8x32xf32>
    %138 = vector.extract_strided_slice %135 {offsets = [0, 32], sizes = [8, 32], strides = [1, 1]} : vector<8x128xf32> to vector<8x32xf32>
    %139 = vector.extract_strided_slice %136 {offsets = [0, 64], sizes = [8, 32], strides = [1, 1]} : vector<8x128xf32> to vector<8x32xf32>
    %140 = vector.extract_strided_slice %135 {offsets = [0, 96], sizes = [8, 32], strides = [1, 1]} : vector<8x128xf32> to vector<8x32xf32>
    %141 = arith.mulf %138, %120 : vector<8x32xf32>
    %142 = arith.mulf %137, %139 : vector<8x32xf32>
    %143 = arith.addf %141, %142 : vector<8x32xf32>
    %144 = math.tanh %143 : vector<8x32xf32>
    %145 = arith.mulf %140, %144 : vector<8x32xf32>
    %146 = arith.index_cast %126 : i32 to index
    %c0_39 = arith.constant 0 : index
    %147 = vector.load %arg11[%146, %c0_39] : memref<64x32xf32, #tpu.memory_space<vmem>>, vector<8x32xf32>
    tpu.vector_store %arg11[%146, %c0_39], %145 {strides = array<i32>} : memref<64x32xf32, #tpu.memory_space<vmem>>, vector<8x32xf32>,
    %c6_i32 = arith.constant 6 : i32
    %c8_i32_40 = arith.constant 8 : i32
    %148 = arith.muli %c6_i32, %c8_i32_40 : i32
    %149 = tpu.assume_multiple %148, 8 : i32
    %150 = arith.index_cast %149 : i32 to index
    %c0_41 = arith.constant 0 : index
    %151 = vector.load %arg10[%150, %c0_41] : memref<64x128xf32, #tpu.memory_space<vmem>>, vector<8x128xf32>
    %cst_42 = arith.constant dense<0.000000e+00> : vector<8x128xf32>
    %152 = tpu.matmul %145, %1, %cst_42 {dimension_numbers = #tpu.dot_dimension_numbers<[1], [0], [0], [1], [0, 0, 1, 1], [], []>} : vector<8x32xf32>, vector<32x128xf32>, vector<8x128xf32> -> vector<8x128xf32>
    %153 = arith.addf %151, %152 : vector<8x128xf32>
    %154 = arith.negf %153 : vector<8x128xf32>
    %155 = math.exp %154 : vector<8x128xf32>
    %cst_43 = arith.constant 1.000000e+00 : f32
    %156 = vector.broadcast %cst_43 : f32 to vector<8x128xf32>
    %157 = arith.addf %156, %155 : vector<8x128xf32>
    %158 = arith.divf %156, %157 : vector<8x128xf32>
    %159 = math.tanh %153 : vector<8x128xf32>
    %160 = vector.extract_strided_slice %158 {offsets = [0, 0], sizes = [8, 32], strides = [1, 1]} : vector<8x128xf32> to vector<8x32xf32>
    %161 = vector.extract_strided_slice %158 {offsets = [0, 32], sizes = [8, 32], strides = [1, 1]} : vector<8x128xf32> to vector<8x32xf32>
    %162 = vector.extract_strided_slice %159 {offsets = [0, 64], sizes = [8, 32], strides = [1, 1]} : vector<8x128xf32> to vector<8x32xf32>
    %163 = vector.extract_strided_slice %158 {offsets = [0, 96], sizes = [8, 32], strides = [1, 1]} : vector<8x128xf32> to vector<8x32xf32>
    %164 = arith.mulf %161, %143 : vector<8x32xf32>
    %165 = arith.mulf %160, %162 : vector<8x32xf32>
    %166 = arith.addf %164, %165 : vector<8x32xf32>
    %167 = math.tanh %166 : vector<8x32xf32>
    %168 = arith.mulf %163, %167 : vector<8x32xf32>
    %169 = arith.index_cast %149 : i32 to index
    %c0_44 = arith.constant 0 : index
    %170 = vector.load %arg11[%169, %c0_44] : memref<64x32xf32, #tpu.memory_space<vmem>>, vector<8x32xf32>
    tpu.vector_store %arg11[%169, %c0_44], %168 {strides = array<i32>} : memref<64x32xf32, #tpu.memory_space<vmem>>, vector<8x32xf32>,
    %c7_i32 = arith.constant 7 : i32
    %c8_i32_45 = arith.constant 8 : i32
    %171 = arith.muli %c7_i32, %c8_i32_45 : i32
    %172 = tpu.assume_multiple %171, 8 : i32
    %173 = arith.index_cast %172 : i32 to index
    %c0_46 = arith.constant 0 : index
    %174 = vector.load %arg10[%173, %c0_46] : memref<64x128xf32, #tpu.memory_space<vmem>>, vector<8x128xf32>
    %cst_47 = arith.constant dense<0.000000e+00> : vector<8x128xf32>
    %175 = tpu.matmul %168, %1, %cst_47 {dimension_numbers = #tpu.dot_dimension_numbers<[1], [0], [0], [1], [0, 0, 1, 1], [], []>} : vector<8x32xf32>, vector<32x128xf32>, vector<8x128xf32> -> vector<8x128xf32>
    %176 = arith.addf %174, %175 : vector<8x128xf32>
    %177 = arith.negf %176 : vector<8x128xf32>
    %178 = math.exp %177 : vector<8x128xf32>
    %cst_48 = arith.constant 1.000000e+00 : f32
    %179 = vector.broadcast %cst_48 : f32 to vector<8x128xf32>
    %180 = arith.addf %179, %178 : vector<8x128xf32>
    %181 = arith.divf %179, %180 : vector<8x128xf32>
    %182 = math.tanh %176 : vector<8x128xf32>
    %183 = vector.extract_strided_slice %181 {offsets = [0, 0], sizes = [8, 32], strides = [1, 1]} : vector<8x128xf32> to vector<8x32xf32>
    %184 = vector.extract_strided_slice %181 {offsets = [0, 32], sizes = [8, 32], strides = [1, 1]} : vector<8x128xf32> to vector<8x32xf32>
    %185 = vector.extract_strided_slice %182 {offsets = [0, 64], sizes = [8, 32], strides = [1, 1]} : vector<8x128xf32> to vector<8x32xf32>
    %186 = vector.extract_strided_slice %181 {offsets = [0, 96], sizes = [8, 32], strides = [1, 1]} : vector<8x128xf32> to vector<8x32xf32>
    %187 = arith.mulf %184, %166 : vector<8x32xf32>
    %188 = arith.mulf %183, %185 : vector<8x32xf32>
    %189 = arith.addf %187, %188 : vector<8x32xf32>
    %190 = math.tanh %189 : vector<8x32xf32>
    %191 = arith.mulf %186, %190 : vector<8x32xf32>
    %192 = arith.index_cast %172 : i32 to index
    %c0_49 = arith.constant 0 : index
    %193 = vector.load %arg11[%192, %c0_49] : memref<64x32xf32, #tpu.memory_space<vmem>>, vector<8x32xf32>
    tpu.vector_store %arg11[%192, %c0_49], %191 {strides = array<i32>} : memref<64x32xf32, #tpu.memory_space<vmem>>, vector<8x32xf32>,
    %c8_i32_50 = arith.constant 8 : i32
    %c0_51 = arith.constant 0 : index
    %c0_52 = arith.constant 0 : index
    %194 = vector.load %arg4[%c0_51, %c0_52] : memref<32x128xf32, #tpu.memory_space<vmem>>, vector<32x128xf32>
    %c0_53 = arith.constant 0 : index
    %c0_54 = arith.constant 0 : index
    %195 = vector.load %arg5[%c0_53, %c0_54] : memref<32x128xf32, #tpu.memory_space<vmem>>, vector<32x128xf32>
    %c0_55 = arith.constant 0 : index
    %c0_56 = arith.constant 0 : index
    %196 = vector.load %arg6[%c0_55, %c0_56] : memref<1x128xf32, #tpu.memory_space<vmem>>, vector<1x128xf32>
    %c0_57 = arith.constant 0 : index
    %c0_58 = arith.constant 0 : index
    %197 = vector.load %arg11[%c0_57, %c0_58] : memref<64x32xf32, #tpu.memory_space<vmem>>, vector<64x32xf32>
    %cst_59 = arith.constant dense<0.000000e+00> : vector<64x128xf32>
    %198 = tpu.matmul %197, %194, %cst_59 {dimension_numbers = #tpu.dot_dimension_numbers<[1], [0], [0], [1], [0, 0, 1, 1], [], []>} : vector<64x32xf32>, vector<32x128xf32>, vector<64x128xf32> -> vector<64x128xf32>
    %199 = vector.broadcast %196 : vector<1x128xf32> to vector<64x128xf32>
    %200 = arith.addf %198, %199 : vector<64x128xf32>
    %c0_60 = arith.constant 0 : index
    %c0_61 = arith.constant 0 : index
    %201 = vector.load %arg10[%c0_60, %c0_61] : memref<64x128xf32, #tpu.memory_space<vmem>>, vector<64x128xf32>
    tpu.vector_store %arg10[%c0_60, %c0_61], %200 {strides = array<i32>} : memref<64x128xf32, #tpu.memory_space<vmem>>, vector<64x128xf32>,
    %cst_62 = arith.constant 0.000000e+00 : f32
    %202 = vector.broadcast %cst_62 : f32 to vector<8x32xf32>
    %cst_63 = arith.constant 0.000000e+00 : f32
    %203 = vector.broadcast %cst_63 : f32 to vector<8x32xf32>
    %c0_i32_64 = arith.constant 0 : i32
    %c8_i32_65 = arith.constant 8 : i32
    %204 = arith.muli %c0_i32_64, %c8_i32_65 : i32
    %205 = tpu.assume_multiple %204, 8 : i32
    %206 = arith.index_cast %205 : i32 to index
    %c0_66 = arith.constant 0 : index
    %207 = vector.load %arg10[%206, %c0_66] : memref<64x128xf32, #tpu.memory_space<vmem>>, vector<8x128xf32>
    %cst_67 = arith.constant dense<0.000000e+00> : vector<8x128xf32>
    %208 = tpu.matmul %202, %195, %cst_67 {dimension_numbers = #tpu.dot_dimension_numbers<[1], [0], [0], [1], [0, 0, 1, 1], [], []>} : vector<8x32xf32>, vector<32x128xf32>, vector<8x128xf32> -> vector<8x128xf32>
    %209 = arith.addf %207, %208 : vector<8x128xf32>
    %210 = arith.negf %209 : vector<8x128xf32>
    %211 = math.exp %210 : vector<8x128xf32>
    %cst_68 = arith.constant 1.000000e+00 : f32
    %212 = vector.broadcast %cst_68 : f32 to vector<8x128xf32>
    %213 = arith.addf %212, %211 : vector<8x128xf32>
    %214 = arith.divf %212, %213 : vector<8x128xf32>
    %215 = math.tanh %209 : vector<8x128xf32>
    %216 = vector.extract_strided_slice %214 {offsets = [0, 0], sizes = [8, 32], strides = [1, 1]} : vector<8x128xf32> to vector<8x32xf32>
    %217 = vector.extract_strided_slice %214 {offsets = [0, 32], sizes = [8, 32], strides = [1, 1]} : vector<8x128xf32> to vector<8x32xf32>
    %218 = vector.extract_strided_slice %215 {offsets = [0, 64], sizes = [8, 32], strides = [1, 1]} : vector<8x128xf32> to vector<8x32xf32>
    %219 = vector.extract_strided_slice %214 {offsets = [0, 96], sizes = [8, 32], strides = [1, 1]} : vector<8x128xf32> to vector<8x32xf32>
    %220 = arith.mulf %217, %203 : vector<8x32xf32>
    %221 = arith.mulf %216, %218 : vector<8x32xf32>
    %222 = arith.addf %220, %221 : vector<8x32xf32>
    %223 = math.tanh %222 : vector<8x32xf32>
    %224 = arith.mulf %219, %223 : vector<8x32xf32>
    %c1_i32_69 = arith.constant 1 : i32
    %c8_i32_70 = arith.constant 8 : i32
    %225 = arith.muli %c1_i32_69, %c8_i32_70 : i32
    %226 = tpu.assume_multiple %225, 8 : i32
    %227 = arith.index_cast %226 : i32 to index
    %c0_71 = arith.constant 0 : index
    %228 = vector.load %arg10[%227, %c0_71] : memref<64x128xf32, #tpu.memory_space<vmem>>, vector<8x128xf32>
    %cst_72 = arith.constant dense<0.000000e+00> : vector<8x128xf32>
    %229 = tpu.matmul %224, %195, %cst_72 {dimension_numbers = #tpu.dot_dimension_numbers<[1], [0], [0], [1], [0, 0, 1, 1], [], []>} : vector<8x32xf32>, vector<32x128xf32>, vector<8x128xf32> -> vector<8x128xf32>
    %230 = arith.addf %228, %229 : vector<8x128xf32>
    %231 = arith.negf %230 : vector<8x128xf32>
    %232 = math.exp %231 : vector<8x128xf32>
    %cst_73 = arith.constant 1.000000e+00 : f32
    %233 = vector.broadcast %cst_73 : f32 to vector<8x128xf32>
    %234 = arith.addf %233, %232 : vector<8x128xf32>
    %235 = arith.divf %233, %234 : vector<8x128xf32>
    %236 = math.tanh %230 : vector<8x128xf32>
    %237 = vector.extract_strided_slice %235 {offsets = [0, 0], sizes = [8, 32], strides = [1, 1]} : vector<8x128xf32> to vector<8x32xf32>
    %238 = vector.extract_strided_slice %235 {offsets = [0, 32], sizes = [8, 32], strides = [1, 1]} : vector<8x128xf32> to vector<8x32xf32>
    %239 = vector.extract_strided_slice %236 {offsets = [0, 64], sizes = [8, 32], strides = [1, 1]} : vector<8x128xf32> to vector<8x32xf32>
    %240 = vector.extract_strided_slice %235 {offsets = [0, 96], sizes = [8, 32], strides = [1, 1]} : vector<8x128xf32> to vector<8x32xf32>
    %241 = arith.mulf %238, %222 : vector<8x32xf32>
    %242 = arith.mulf %237, %239 : vector<8x32xf32>
    %243 = arith.addf %241, %242 : vector<8x32xf32>
    %244 = math.tanh %243 : vector<8x32xf32>
    %245 = arith.mulf %240, %244 : vector<8x32xf32>
    %c2_i32_74 = arith.constant 2 : i32
    %c8_i32_75 = arith.constant 8 : i32
    %246 = arith.muli %c2_i32_74, %c8_i32_75 : i32
    %247 = tpu.assume_multiple %246, 8 : i32
    %248 = arith.index_cast %247 : i32 to index
    %c0_76 = arith.constant 0 : index
    %249 = vector.load %arg10[%248, %c0_76] : memref<64x128xf32, #tpu.memory_space<vmem>>, vector<8x128xf32>
    %cst_77 = arith.constant dense<0.000000e+00> : vector<8x128xf32>
    %250 = tpu.matmul %245, %195, %cst_77 {dimension_numbers = #tpu.dot_dimension_numbers<[1], [0], [0], [1], [0, 0, 1, 1], [], []>} : vector<8x32xf32>, vector<32x128xf32>, vector<8x128xf32> -> vector<8x128xf32>
    %251 = arith.addf %249, %250 : vector<8x128xf32>
    %252 = arith.negf %251 : vector<8x128xf32>
    %253 = math.exp %252 : vector<8x128xf32>
    %cst_78 = arith.constant 1.000000e+00 : f32
    %254 = vector.broadcast %cst_78 : f32 to vector<8x128xf32>
    %255 = arith.addf %254, %253 : vector<8x128xf32>
    %256 = arith.divf %254, %255 : vector<8x128xf32>
    %257 = math.tanh %251 : vector<8x128xf32>
    %258 = vector.extract_strided_slice %256 {offsets = [0, 0], sizes = [8, 32], strides = [1, 1]} : vector<8x128xf32> to vector<8x32xf32>
    %259 = vector.extract_strided_slice %256 {offsets = [0, 32], sizes = [8, 32], strides = [1, 1]} : vector<8x128xf32> to vector<8x32xf32>
    %260 = vector.extract_strided_slice %257 {offsets = [0, 64], sizes = [8, 32], strides = [1, 1]} : vector<8x128xf32> to vector<8x32xf32>
    %261 = vector.extract_strided_slice %256 {offsets = [0, 96], sizes = [8, 32], strides = [1, 1]} : vector<8x128xf32> to vector<8x32xf32>
    %262 = arith.mulf %259, %243 : vector<8x32xf32>
    %263 = arith.mulf %258, %260 : vector<8x32xf32>
    %264 = arith.addf %262, %263 : vector<8x32xf32>
    %265 = math.tanh %264 : vector<8x32xf32>
    %266 = arith.mulf %261, %265 : vector<8x32xf32>
    %c3_i32_79 = arith.constant 3 : i32
    %c8_i32_80 = arith.constant 8 : i32
    %267 = arith.muli %c3_i32_79, %c8_i32_80 : i32
    %268 = tpu.assume_multiple %267, 8 : i32
    %269 = arith.index_cast %268 : i32 to index
    %c0_81 = arith.constant 0 : index
    %270 = vector.load %arg10[%269, %c0_81] : memref<64x128xf32, #tpu.memory_space<vmem>>, vector<8x128xf32>
    %cst_82 = arith.constant dense<0.000000e+00> : vector<8x128xf32>
    %271 = tpu.matmul %266, %195, %cst_82 {dimension_numbers = #tpu.dot_dimension_numbers<[1], [0], [0], [1], [0, 0, 1, 1], [], []>} : vector<8x32xf32>, vector<32x128xf32>, vector<8x128xf32> -> vector<8x128xf32>
    %272 = arith.addf %270, %271 : vector<8x128xf32>
    %273 = arith.negf %272 : vector<8x128xf32>
    %274 = math.exp %273 : vector<8x128xf32>
    %cst_83 = arith.constant 1.000000e+00 : f32
    %275 = vector.broadcast %cst_83 : f32 to vector<8x128xf32>
    %276 = arith.addf %275, %274 : vector<8x128xf32>
    %277 = arith.divf %275, %276 : vector<8x128xf32>
    %278 = math.tanh %272 : vector<8x128xf32>
    %279 = vector.extract_strided_slice %277 {offsets = [0, 0], sizes = [8, 32], strides = [1, 1]} : vector<8x128xf32> to vector<8x32xf32>
    %280 = vector.extract_strided_slice %277 {offsets = [0, 32], sizes = [8, 32], strides = [1, 1]} : vector<8x128xf32> to vector<8x32xf32>
    %281 = vector.extract_strided_slice %278 {offsets = [0, 64], sizes = [8, 32], strides = [1, 1]} : vector<8x128xf32> to vector<8x32xf32>
    %282 = vector.extract_strided_slice %277 {offsets = [0, 96], sizes = [8, 32], strides = [1, 1]} : vector<8x128xf32> to vector<8x32xf32>
    %283 = arith.mulf %280, %264 : vector<8x32xf32>
    %284 = arith.mulf %279, %281 : vector<8x32xf32>
    %285 = arith.addf %283, %284 : vector<8x32xf32>
    %286 = math.tanh %285 : vector<8x32xf32>
    %287 = arith.mulf %282, %286 : vector<8x32xf32>
    %c4_i32_84 = arith.constant 4 : i32
    %c8_i32_85 = arith.constant 8 : i32
    %288 = arith.muli %c4_i32_84, %c8_i32_85 : i32
    %289 = tpu.assume_multiple %288, 8 : i32
    %290 = arith.index_cast %289 : i32 to index
    %c0_86 = arith.constant 0 : index
    %291 = vector.load %arg10[%290, %c0_86] : memref<64x128xf32, #tpu.memory_space<vmem>>, vector<8x128xf32>
    %cst_87 = arith.constant dense<0.000000e+00> : vector<8x128xf32>
    %292 = tpu.matmul %287, %195, %cst_87 {dimension_numbers = #tpu.dot_dimension_numbers<[1], [0], [0], [1], [0, 0, 1, 1], [], []>} : vector<8x32xf32>, vector<32x128xf32>, vector<8x128xf32> -> vector<8x128xf32>
    %293 = arith.addf %291, %292 : vector<8x128xf32>
    %294 = arith.negf %293 : vector<8x128xf32>
    %295 = math.exp %294 : vector<8x128xf32>
    %cst_88 = arith.constant 1.000000e+00 : f32
    %296 = vector.broadcast %cst_88 : f32 to vector<8x128xf32>
    %297 = arith.addf %296, %295 : vector<8x128xf32>
    %298 = arith.divf %296, %297 : vector<8x128xf32>
    %299 = math.tanh %293 : vector<8x128xf32>
    %300 = vector.extract_strided_slice %298 {offsets = [0, 0], sizes = [8, 32], strides = [1, 1]} : vector<8x128xf32> to vector<8x32xf32>
    %301 = vector.extract_strided_slice %298 {offsets = [0, 32], sizes = [8, 32], strides = [1, 1]} : vector<8x128xf32> to vector<8x32xf32>
    %302 = vector.extract_strided_slice %299 {offsets = [0, 64], sizes = [8, 32], strides = [1, 1]} : vector<8x128xf32> to vector<8x32xf32>
    %303 = vector.extract_strided_slice %298 {offsets = [0, 96], sizes = [8, 32], strides = [1, 1]} : vector<8x128xf32> to vector<8x32xf32>
    %304 = arith.mulf %301, %285 : vector<8x32xf32>
    %305 = arith.mulf %300, %302 : vector<8x32xf32>
    %306 = arith.addf %304, %305 : vector<8x32xf32>
    %307 = math.tanh %306 : vector<8x32xf32>
    %308 = arith.mulf %303, %307 : vector<8x32xf32>
    %c5_i32_89 = arith.constant 5 : i32
    %c8_i32_90 = arith.constant 8 : i32
    %309 = arith.muli %c5_i32_89, %c8_i32_90 : i32
    %310 = tpu.assume_multiple %309, 8 : i32
    %311 = arith.index_cast %310 : i32 to index
    %c0_91 = arith.constant 0 : index
    %312 = vector.load %arg10[%311, %c0_91] : memref<64x128xf32, #tpu.memory_space<vmem>>, vector<8x128xf32>
    %cst_92 = arith.constant dense<0.000000e+00> : vector<8x128xf32>
    %313 = tpu.matmul %308, %195, %cst_92 {dimension_numbers = #tpu.dot_dimension_numbers<[1], [0], [0], [1], [0, 0, 1, 1], [], []>} : vector<8x32xf32>, vector<32x128xf32>, vector<8x128xf32> -> vector<8x128xf32>
    %314 = arith.addf %312, %313 : vector<8x128xf32>
    %315 = arith.negf %314 : vector<8x128xf32>
    %316 = math.exp %315 : vector<8x128xf32>
    %cst_93 = arith.constant 1.000000e+00 : f32
    %317 = vector.broadcast %cst_93 : f32 to vector<8x128xf32>
    %318 = arith.addf %317, %316 : vector<8x128xf32>
    %319 = arith.divf %317, %318 : vector<8x128xf32>
    %320 = math.tanh %314 : vector<8x128xf32>
    %321 = vector.extract_strided_slice %319 {offsets = [0, 0], sizes = [8, 32], strides = [1, 1]} : vector<8x128xf32> to vector<8x32xf32>
    %322 = vector.extract_strided_slice %319 {offsets = [0, 32], sizes = [8, 32], strides = [1, 1]} : vector<8x128xf32> to vector<8x32xf32>
    %323 = vector.extract_strided_slice %320 {offsets = [0, 64], sizes = [8, 32], strides = [1, 1]} : vector<8x128xf32> to vector<8x32xf32>
    %324 = vector.extract_strided_slice %319 {offsets = [0, 96], sizes = [8, 32], strides = [1, 1]} : vector<8x128xf32> to vector<8x32xf32>
    %325 = arith.mulf %322, %306 : vector<8x32xf32>
    %326 = arith.mulf %321, %323 : vector<8x32xf32>
    %327 = arith.addf %325, %326 : vector<8x32xf32>
    %328 = math.tanh %327 : vector<8x32xf32>
    %329 = arith.mulf %324, %328 : vector<8x32xf32>
    %c6_i32_94 = arith.constant 6 : i32
    %c8_i32_95 = arith.constant 8 : i32
    %330 = arith.muli %c6_i32_94, %c8_i32_95 : i32
    %331 = tpu.assume_multiple %330, 8 : i32
    %332 = arith.index_cast %331 : i32 to index
    %c0_96 = arith.constant 0 : index
    %333 = vector.load %arg10[%332, %c0_96] : memref<64x128xf32, #tpu.memory_space<vmem>>, vector<8x128xf32>
    %cst_97 = arith.constant dense<0.000000e+00> : vector<8x128xf32>
    %334 = tpu.matmul %329, %195, %cst_97 {dimension_numbers = #tpu.dot_dimension_numbers<[1], [0], [0], [1], [0, 0, 1, 1], [], []>} : vector<8x32xf32>, vector<32x128xf32>, vector<8x128xf32> -> vector<8x128xf32>
    %335 = arith.addf %333, %334 : vector<8x128xf32>
    %336 = arith.negf %335 : vector<8x128xf32>
    %337 = math.exp %336 : vector<8x128xf32>
    %cst_98 = arith.constant 1.000000e+00 : f32
    %338 = vector.broadcast %cst_98 : f32 to vector<8x128xf32>
    %339 = arith.addf %338, %337 : vector<8x128xf32>
    %340 = arith.divf %338, %339 : vector<8x128xf32>
    %341 = math.tanh %335 : vector<8x128xf32>
    %342 = vector.extract_strided_slice %340 {offsets = [0, 0], sizes = [8, 32], strides = [1, 1]} : vector<8x128xf32> to vector<8x32xf32>
    %343 = vector.extract_strided_slice %340 {offsets = [0, 32], sizes = [8, 32], strides = [1, 1]} : vector<8x128xf32> to vector<8x32xf32>
    %344 = vector.extract_strided_slice %341 {offsets = [0, 64], sizes = [8, 32], strides = [1, 1]} : vector<8x128xf32> to vector<8x32xf32>
    %345 = vector.extract_strided_slice %340 {offsets = [0, 96], sizes = [8, 32], strides = [1, 1]} : vector<8x128xf32> to vector<8x32xf32>
    %346 = arith.mulf %343, %327 : vector<8x32xf32>
    %347 = arith.mulf %342, %344 : vector<8x32xf32>
    %348 = arith.addf %346, %347 : vector<8x32xf32>
    %349 = math.tanh %348 : vector<8x32xf32>
    %350 = arith.mulf %345, %349 : vector<8x32xf32>
    %c7_i32_99 = arith.constant 7 : i32
    %c8_i32_100 = arith.constant 8 : i32
    %351 = arith.muli %c7_i32_99, %c8_i32_100 : i32
    %352 = tpu.assume_multiple %351, 8 : i32
    %353 = arith.index_cast %352 : i32 to index
    %c0_101 = arith.constant 0 : index
    %354 = vector.load %arg10[%353, %c0_101] : memref<64x128xf32, #tpu.memory_space<vmem>>, vector<8x128xf32>
    %cst_102 = arith.constant dense<0.000000e+00> : vector<8x128xf32>
    %355 = tpu.matmul %350, %195, %cst_102 {dimension_numbers = #tpu.dot_dimension_numbers<[1], [0], [0], [1], [0, 0, 1, 1], [], []>} : vector<8x32xf32>, vector<32x128xf32>, vector<8x128xf32> -> vector<8x128xf32>
    %356 = arith.addf %354, %355 : vector<8x128xf32>
    %357 = arith.negf %356 : vector<8x128xf32>
    %358 = math.exp %357 : vector<8x128xf32>
    %cst_103 = arith.constant 1.000000e+00 : f32
    %359 = vector.broadcast %cst_103 : f32 to vector<8x128xf32>
    %360 = arith.addf %359, %358 : vector<8x128xf32>
    %361 = arith.divf %359, %360 : vector<8x128xf32>
    %362 = math.tanh %356 : vector<8x128xf32>
    %363 = vector.extract_strided_slice %361 {offsets = [0, 0], sizes = [8, 32], strides = [1, 1]} : vector<8x128xf32> to vector<8x32xf32>
    %364 = vector.extract_strided_slice %361 {offsets = [0, 32], sizes = [8, 32], strides = [1, 1]} : vector<8x128xf32> to vector<8x32xf32>
    %365 = vector.extract_strided_slice %362 {offsets = [0, 64], sizes = [8, 32], strides = [1, 1]} : vector<8x128xf32> to vector<8x32xf32>
    %366 = vector.extract_strided_slice %361 {offsets = [0, 96], sizes = [8, 32], strides = [1, 1]} : vector<8x128xf32> to vector<8x32xf32>
    %367 = arith.mulf %364, %348 : vector<8x32xf32>
    %368 = arith.mulf %363, %365 : vector<8x32xf32>
    %369 = arith.addf %367, %368 : vector<8x32xf32>
    %370 = math.tanh %369 : vector<8x32xf32>
    %371 = arith.mulf %366, %370 : vector<8x32xf32>
    %c8_i32_104 = arith.constant 8 : i32
    %c0_105 = arith.constant 0 : index
    %c0_106 = arith.constant 0 : index
    %372 = vector.load %arg7[%c0_105, %c0_106] : memref<32x3xf32, #tpu.memory_space<vmem>>, vector<32x3xf32>
    %cst_107 = arith.constant dense<0.000000e+00> : vector<8x3xf32>
    %373 = tpu.matmul %371, %372, %cst_107 {dimension_numbers = #tpu.dot_dimension_numbers<[1], [0], [0], [1], [0, 0, 1, 1], [], []>} : vector<8x32xf32>, vector<32x3xf32>, vector<8x3xf32> -> vector<8x3xf32>
    %c0_108 = arith.constant 0 : index
    %c0_109 = arith.constant 0 : index
    %374 = vector.load %arg8[%c0_108, %c0_109] : memref<1x3xf32, #tpu.memory_space<vmem>>, vector<1x3xf32>
    %375 = vector.broadcast %374 : vector<1x3xf32> to vector<8x3xf32>
    %376 = arith.addf %373, %375 : vector<8x3xf32>
    %c0_110 = arith.constant 0 : index
    %c0_111 = arith.constant 0 : index
    %377 = vector.load %arg9[%c0_110, %c0_111] : memref<8x3xf32, #tpu.memory_space<vmem>>, vector<8x3xf32>
    tpu.vector_store %arg9[%c0_110, %c0_111], %376 {strides = array<i32>} : memref<8x3xf32, #tpu.memory_space<vmem>>, vector<8x3xf32>,
    return
  }
}

</mosaic_0001>

<bundles_post_ra>
// kernel: lstm_fault_predictor.1
= control target key start
LH: loop header
LB: loop body
LE: loop exit
PB: predicated region body
PF: predicated region fallthrough
CT: control target
= control target key end

     0   :  { %vm77_vm0 = vcmask 1043456   ;;  %vm52_vm1 = vcmask 31744   ;;  %v2710_v0 = vmov 0.0|0.0   ;;  %vm2711_vm2 = vmmov 0   ;;  %s2713_s23 = smov 64   ;;  %s3124_s2 = inlined_call_operand.vmem [shape: f32[32,128], index: 2, kind: input, shape index: {}]   ;;  %s3125_s1 = inlined_call_operand.vmem [shape: f32[4,128], index: 1, kind: input, shape index: {}]   ;;  %s3126_s0 = inlined_call_operand.vmem [shape: f32[64,4], index: 0, kind: input, shape index: {}]   ;;  %s3127_s3 = inlined_call_operand.vmem [shape: f32[1,128], index: 3, kind: input, shape index: {}]   ;;  %s3128_s4 = inlined_call_operand.vmem [shape: f32[32,128], index: 4, kind: input, shape index: {}]   ;;  %s3129_s5 = inlined_call_operand.vmem [shape: f32[32,128], index: 5, kind: input, shape index: {}]   ;;  %s3130_s6 = inlined_call_operand.vmem [shape: f32[1,128], index: 6, kind: input, shape index: {}]   ;;  %s3131_s7 = inlined_call_operand.vmem [shape: f32[32,3], index: 7, kind: input, shape index: {}]   ;;  %s3132_s8 = inlined_call_operand.vmem [shape: f32[1,3], index: 8, kind: input, shape index: {}]   ;;  %s3133_s9 = inlined_call_operand.vmem [shape: f32[8,3], index: 9, kind: output, shape index: {}]  }
   0x1   :  { %2467 = vmatprep.subr.bf16.mxu1 %v2710_v0  ;;  %v33_v1 = vld [vmem:[%s3124_s2] sm:$0xff]  ;;  %v34_v2 = vld [vmem:[%s3124_s2 + $0x8] sm:$0xff]  ;;  %v35_v7 = vld [vmem:[%s3124_s2 + $0x10] sm:$0xff]  ;;  %v2712_v8 = vmov 0.0   ;;  %vm195_vm3 = vcmask 261120   ;;  %vm2083_vm4 = vcmask 23552  }
   0x2   :  { %v32_v3 = vld [vmem:[%s3125_s1] sm:$0xf]  ;;  %v2775_v4 = vpack.c.bf16 %v34_v2, %v33_v1  ;;  %v39_v6 = vld [vmem:[%s3126_s0 + $0x8] sm:$0xff]  ;;  %2268 = vmatprep.mubr.msk.f32.mxu1 %vm2711_vm2, %v2712_v8  ;;  %v36_v9 = vld [vmem:[%s3124_s2 + $0x18] sm:$0xff] }
   0x3   :  { %2246 = vmatprep.subr.msk.mxu0 %vm77_vm0, %v32_v3  ;;  %v38_v5 = vld [vmem:[%s3126_s0] sm:$0xff]  ;;  %v2796_v10 = vpack.c.bf16 %v36_v9, %v35_v7  ;;  %v40_v46 = vld [vmem:[%s3126_s0 + $0x10] sm:$0xff]  ;;  %v41_v47 = vld [vmem:[%s3126_s0 + $0x18] sm:$0xff] }
   0x4   :  { %2247 = vmatpush3.msk.msra.mxu0 %vm77_vm0, %v32_v3  ;;  %2248 = vmatprep.mubr.msk.f32.mxu0 %vm52_vm1, %v38_v5  ;;  %v2816_v12 = vld [vmem:[%s3127_s3] ss:$0 sm:$0xff]  ;;  %s2714_s3 = smov 32   ;;  %v43_v49 = vld [vmem:[%s3126_s0 + $0x28] sm:$0xff]  ;;  %v44_v50 = vld [vmem:[%s3126_s0 + $0x30] sm:$0xff] }
   0x5   :  { %2469 = vmatpush3.bf16.msra.mxu1 %v2775_v4  ;;  %2249 = vmatmul.mubr.msk.f32.vlgmr.msra.gmra.mrb[0].mxu0 %vm52_vm1, %v39_v6  ;;  %v42_v48 = vld [vmem:[%s3126_s0 + $0x20] sm:$0xff]  ;;  %v45_v51 = vld [vmem:[%s3126_s0 + $0x38] sm:$0xff] }
   0x6   :  { %2470 = vmatprep.subr.bf16.mxu1 %v2710_v0  ;;  %2479 = vmatprep.subr.bf16.mxu0 %v2710_v0 }
   0x7   :  { %2481 = vmatpush3.bf16.msra.mxu0 %v2775_v4  ;;  %2251 = vmatprep.mubr.msk.f32.mxu0 %vm52_vm1, %v40_v46 }
   0x8   :  { %2482 = vmatprep.subr.bf16.mxu0 %v2710_v0 }
   0x9   :  { %2472 = vmatpush3.bf16.msra.mxu1 %v2796_v10  ;;  %2252 = vmatmul.mubr.msk.f32.gmra.mrb[2].mxu0 %vm52_vm1, %v41_v47 }
   0xa   :  { %2473 = vmatprep.subr.bf16.mxu1 %v2710_v0  ;;  %2254 = vmatprep.mubr.msk.f32.mxu0 %vm52_vm1, %v42_v48 }
   0xb   :  { %2484 = vmatpush3.bf16.msra.mxu0 %v2796_v10 }
   0xc   :  { %2269 = vmatmul.mubr.f32.vlgmr.msra.gmra.mrb[0].mxu1 %v2712_v8  ;;  %2491 = vmatprep.subr.bf16.mxu0 %v2710_v0 }
   0xd   :  { %2475 = vmatpush3.bf16.msra.mxu1 %v2775_v4  ;;  %2279 = vmatprep.mubr.msk.f32.mxu1 %vm2711_vm2, %v2712_v8 }
   0xe   :  { %2476 = vmatprep.subr.bf16.mxu1 %v2710_v0  ;;  %2255 = vmatmul.mubr.msk.f32.gmra.mrb[4].mxu0 %vm52_vm1, %v43_v49 }
   0xf   :  { %2257 = vmatprep.mubr.msk.f32.mxu0 %vm52_vm1, %v44_v50 }
  0x11   :  { %2478 = vmatpush3.bf16.msra.mxu1 %v2796_v10 }
  0x12   :  { %2485 = vmatprep.subr.bf16.mxu1 %v2710_v0  ;;  %2258 = vmatmul.mubr.msk.f32.gmra.mrb[6].mxu0 %vm52_vm1, %v45_v51 }
  0x13   :  { %2290 = vmatprep.mubr.msk.f32.mxu0 %vm2711_vm2, %v2712_v8 }
  0xd8   :  { %v2250_v11 = vpop.f32.mrb[0].mxu0 }
  0xd9   :  { %v147_v13 = vpop.f32.mrb[1].mxu0  ;;  %v153_v32 = vadd.f32 %v2250_v11, %v2816_v12 }
  0xda   :  { %v148_v14 = vadd.f32 %v2816_v12, %v147_v13 }
  0xdc   :  { %v2253_v55 = vpop.f32.mrb[2].mxu0 }
  0xdd   :  { %v157_v56 = vpop.f32.mrb[3].mxu0 }
  0xde   :  { %v158_v62 = vadd.f32 %v2816_v12, %v157_v56 }
  0xdf   :  { %v265_v15 = vpop.f32.mrb[0].mxu1 }
  0xe0   :  { %v269_v16 = vadd.f32 %v265_v15, %v148_v14  ;;  %v2270_v17 = vpop.f32.mrb[1].mxu1 }
  0xe1   :  { %v2862_v57 = vpop.f32.mrb[4].mxu0 }
  0xe2   :  { %2582 = vtanh.f32 %v269_v16  ;;  %v2099_v19 = vmul.f32 -1.442695, %v269_v16  ;;  %v2864_v58 = vpop.f32.mrb[5].mxu0 }
  0xe4   :  { %2584 = vpow2.f32 %v2099_v19 }
  0xe5   :  { %v2866_v59 = vpop.f32.mrb[6].mxu0 }
  0xe6   :  { %v2868_v60 = vpop.f32.mrb[7].mxu0 }
  0xec   :  { %v2583_v18 = vpop.eup %2582 }
  0xed   :  { %279 = vrot.lane.b32.xlu0 %v2583_v18, %s2713_s23 }
  0xee   :  { %v2585_v20 = vpop.eup %2584 }
  0xef   :  { %v273_v21 = vadd.f32 1.0, %v2585_v20 }
  0xf1   :  { %2586 = vrcp.f32 %v273_v21  ;;  %v163_v21 = vadd.f32 %v2253_v55, %v2816_v12 }
  0xfb   :  { %v2587_v22 = vpop.eup %2586 }
  0xfc   :  { %v277_v25 = vmul.f32 0.0, %v2587_v22 }
 0x15f   :  { %v280_v23 = vpop.permute.xlu0 %279 }
 0x160   :  { %v282_v24 = vmul.f32 %v2587_v22, %v280_v23 }
 0x162   :  { %284 = vrot.lane.b32.xlu0 %v282_v24, %s2714_s3 }
 0x1d4   :  { %v285_v26 = vpop.permute.xlu0 %284 }
 0x1d5   :  { %v287_v27 = vadd.f32 %v285_v26, %v277_v25 }
 0x1d7   :  { %2588 = vtanh.f32 %v287_v27 }
 0x1e1   :  { %v2589_v28 = vpop.eup %2588 }
 0x1e2   :  { %290 = vrot.lane.b32.xlu1 %v2589_v28, %s2713_s23 }
 0x254   :  { %v291_v29 = vpop.permute.xlu1 %290 }
 0x255   :  { %v293_v30 = vmul.f32 %v2587_v22, %v291_v29 }
 0x257   :  { %295 = vrot.lane.b32.xlu1 %v293_v30, %s2714_s3 }
 0x2c9   :  { %v296_v31 = vpop.permute.xlu1 %295 }
 0x2ca   :  { %298 = vst.msk [vmem:[#allocation3] sm:$0xff] %vm195_vm3, %v296_v31  ;;  %2280 = vmatmul.mubr.msk.f32.vlgmr.msra.gmra.mrb[2].mxu1 %vm195_vm3, %v296_v31 }
 0x2cb   :  { %2487 = vmatpush3.bf16.msra.mxu1 %v2775_v4  ;;  %2301 = vmatprep.mubr.msk.f32.mxu1 %vm2711_vm2, %v2712_v8 }
 0x2cc   :  { %2488 = vmatprep.subr.bf16.mxu1 %v2710_v0 }
 0x2cf   :  { %2490 = vmatpush3.bf16.msra.mxu1 %v2796_v10 }
 0x2d0   :  { %2497 = vmatprep.subr.bf16.mxu1 %v2710_v0 }
 0x39d   :  { %v369_v33 = vpop.f32.mrb[2].mxu1 }
 0x39e   :  { %v373_v34 = vadd.f32 %v369_v33, %v153_v32  ;;  %v2281_v35 = vpop.f32.mrb[3].mxu1 }
 0x3a0   :  { %2590 = vtanh.f32 %v373_v34  ;;  %v2101_v37 = vmul.f32 -1.442695, %v373_v34 }
 0x3a2   :  { %2592 = vpow2.f32 %v2101_v37 }
 0x3aa   :  { %v2591_v36 = vpop.eup %2590 }
 0x3ab   :  { %383 = vrot.lane.b32.xlu0 %v2591_v36, %s2713_s23 }
 0x3ac   :  { %v2593_v38 = vpop.eup %2592 }
 0x3ad   :  { %v377_v39 = vadd.f32 1.0, %v2593_v38 }
 0x3af   :  { %2594 = vrcp.f32 %v377_v39  ;;  %v168_v39 = vadd.f32 %v2816_v12, %v2864_v58  ;;  %v173_v58 = vadd.f32 %v2862_v57, %v2816_v12 }
 0x3b9   :  { %v2595_v40 = vpop.eup %2594 }
 0x3ba   :  { %v381_v43 = vmul.f32 %v2595_v40, %v287_v27 }
 0x41d   :  { %v384_v41 = vpop.permute.xlu0 %383 }
 0x41e   :  { %v386_v42 = vmul.f32 %v2595_v40, %v384_v41 }
 0x420   :  { %388 = vrot.lane.b32.xlu1 %v386_v42, %s2714_s3 }
 0x492   :  { %v389_v44 = vpop.permute.xlu1 %388 }
 0x493   :  { %v391_v45 = vadd.f32 %v389_v44, %v381_v43 }
 0x495   :  { %2596 = vtanh.f32 %v391_v45 }
 0x49f   :  { %v2597_v52 = vpop.eup %2596 }
 0x4a0   :  { %394 = vrot.lane.b32.xlu0 %v2597_v52, %s2713_s23 }
 0x512   :  { %v395_v53 = vpop.permute.xlu0 %394 }
 0x513   :  { %v397_v54 = vmul.f32 %v2595_v40, %v395_v53 }
 0x515   :  { %399 = vrot.lane.b32.xlu1 %v397_v54, %s2714_s3 }
 0x587   :  { %v400_v61 = vpop.permute.xlu1 %399 }
 0x588   :  { %403 = vst.msk [vmem:[#allocation3 + $0x8] sm:$0xff] %vm195_vm3, %v400_v61  ;;  %2291 = vmatmul.mubr.msk.f32.vlgmr.msra.gmra.mrb[8].mxu0 %vm195_vm3, %v400_v61 }
 0x589   :  { %2493 = vmatpush3.bf16.msra.mxu0 %v2775_v4  ;;  %2312 = vmatprep.mubr.msk.f32.mxu0 %vm2711_vm2, %v2712_v8 }
 0x58a   :  { %2494 = vmatprep.subr.bf16.mxu0 %v2710_v0 }
 0x58d   :  { %2496 = vmatpush3.bf16.msra.mxu0 %v2796_v10 }
 0x58e   :  { %2503 = vmatprep.subr.bf16.mxu0 %v2710_v0 }
 0x65b   :  { %v474_v63 = vpop.f32.mrb[8].mxu0 }
 0x65c   :  { %v478_v1 = vadd.f32 %v474_v63, %v158_v62  ;;  %v2292_v2 = vpop.f32.mrb[9].mxu0 }
 0x65e   :  { %2598 = vtanh.f32 %v478_v1  ;;  %v2103_v5 = vmul.f32 -1.442695, %v478_v1 }
 0x660   :  { %2600 = vpow2.f32 %v2103_v5 }
 0x668   :  { %v2599_v3 = vpop.eup %2598 }
 0x669   :  { %488 = vrot.lane.b32.xlu0 %v2599_v3, %s2713_s23 }
 0x66a   :  { %v2601_v6 = vpop.eup %2600 }
 0x66b   :  { %v482_v7 = vadd.f32 1.0, %v2601_v6 }
 0x66d   :  { %2602 = vrcp.f32 %v482_v7 }
 0x677   :  { %v2603_v9 = vpop.eup %2602 }
 0x678   :  { %v486_v14 = vmul.f32 %v2603_v9, %v391_v45 }
 0x6db   :  { %v489_v11 = vpop.permute.xlu0 %488 }
 0x6dc   :  { %v491_v13 = vmul.f32 %v2603_v9, %v489_v11  ;;  %v1034_v11 = vld [vmem:[%s3128_s4] sm:$0xff] }
 0x6de   :  { %493 = vrot.lane.b32.xlu1 %v491_v13, %s2714_s3  ;;  %v1035_v13 = vld [vmem:[%s3128_s4 + $0x8] sm:$0xff] }
 0x750   :  { %v494_v15 = vpop.permute.xlu1 %493 }
 0x751   :  { %v496_v16 = vadd.f32 %v494_v15, %v486_v14  ;;  %v2515_v14 = vpack.c.bf16 %v1035_v13, %v1034_v11 }
 0x753   :  { %2604 = vtanh.f32 %v496_v16 }
 0x75d   :  { %v2605_v17 = vpop.eup %2604 }
 0x75e   :  { %499 = vrot.lane.b32.xlu0 %v2605_v17, %s2713_s23 }
 0x7d0   :  { %v500_v18 = vpop.permute.xlu0 %499 }
 0x7d1   :  { %v502_v19 = vmul.f32 %v2603_v9, %v500_v18  ;;  %v1036_v18 = vld [vmem:[%s3128_s4 + $0x10] sm:$0xff] }
 0x7d3   :  { %504 = vrot.lane.b32.xlu1 %v502_v19, %s2714_s3  ;;  %v1037_v19 = vld [vmem:[%s3128_s4 + $0x18] sm:$0xff] }
 0x845   :  { %v505_v20 = vpop.permute.xlu1 %504 }
 0x846   :  { %508 = vst.msk [vmem:[#allocation3 + $0x10] sm:$0xff] %vm195_vm3, %v505_v20  ;;  %2302 = vmatmul.mubr.msk.f32.vlgmr.msra.gmra.mrb[4].mxu1 %vm195_vm3, %v505_v20  ;;  %v2519_v20 = vpack.c.bf16 %v1037_v19, %v1036_v18 }
 0x847   :  { %2499 = vmatpush3.bf16.msra.mxu1 %v2775_v4  ;;  %2323 = vmatprep.mubr.msk.f32.mxu1 %vm2711_vm2, %v2712_v8 }
 0x848   :  { %2500 = vmatprep.subr.bf16.mxu1 %v2710_v0 }
 0x84b   :  { %2502 = vmatpush3.bf16.msra.mxu1 %v2796_v10 }
 0x84c   :  { %2509 = vmatprep.subr.bf16.mxu1 %v2710_v0 }
 0x919   :  { %v579_v22 = vpop.f32.mrb[4].mxu1 }
 0x91a   :  { %v583_v23 = vadd.f32 %v579_v22, %v163_v21  ;;  %v2303_v24 = vpop.f32.mrb[5].mxu1  ;;  %v1043_v22 = vld [vmem:[#allocation3] sm:$0xff] }
 0x91b   :  { %v1045_v24 = vld [vmem:[#allocation3 + $0x10] sm:$0xff] }
 0x91c   :  { %2606 = vtanh.f32 %v583_v23  ;;  %v2105_v26 = vmul.f32 -1.442695, %v583_v23  ;;  %v1044_v23 = vld [vmem:[#allocation3 + $0x8] sm:$0xff] }
 0x91e   :  { %2608 = vpow2.f32 %v2105_v26 }
 0x926   :  { %v2607_v25 = vpop.eup %2606 }
 0x927   :  { %593 = vrot.lane.b32.xlu0 %v2607_v25, %s2713_s23 }
 0x928   :  { %v2609_v27 = vpop.eup %2608 }
 0x929   :  { %v587_v28 = vadd.f32 1.0, %v2609_v27 }
 0x92b   :  { %2610 = vrcp.f32 %v587_v28  ;;  %v178_v28 = vadd.f32 %v2816_v12, %v2868_v60 }
 0x935   :  { %v2611_v29 = vpop.eup %2610 }
 0x936   :  { %v591_v32 = vmul.f32 %v2611_v29, %v496_v16 }
 0x999   :  { %v594_v30 = vpop.permute.xlu0 %593 }
 0x99a   :  { %v596_v31 = vmul.f32 %v2611_v29, %v594_v30 }
 0x99c   :  { %598 = vrot.lane.b32.xlu1 %v596_v31, %s2714_s3 }
 0xa0e   :  { %v599_v33 = vpop.permute.xlu1 %598 }
 0xa0f   :  { %v601_v34 = vadd.f32 %v599_v33, %v591_v32 }
 0xa11   :  { %2612 = vtanh.f32 %v601_v34 }
 0xa1b   :  { %v2613_v35 = vpop.eup %2612 }
 0xa1c   :  { %604 = vrot.lane.b32.xlu0 %v2613_v35, %s2713_s23 }
 0xa8e   :  { %v605_v36 = vpop.permute.xlu0 %604 }
 0xa8f   :  { %v607_v37 = vmul.f32 %v2611_v29, %v605_v36 }
 0xa91   :  { %609 = vrot.lane.b32.xlu1 %v607_v37, %s2714_s3 }
 0xb03   :  { %v610_v38 = vpop.permute.xlu1 %609 }
 0xb04   :  { %613 = vst.msk [vmem:[#allocation3 + $0x18] sm:$0xff] %vm195_vm3, %v610_v38  ;;  %2313 = vmatmul.mubr.msk.f32.vlgmr.msra.gmra.mrb[10].mxu0 %vm195_vm3, %v610_v38 }
 0xb05   :  { %2505 = vmatpush3.bf16.msra.mxu0 %v2775_v4  ;;  %2334 = vmatprep.mubr.msk.f32.mxu0 %vm2711_vm2, %v2712_v8 }
 0xb06   :  { %2506 = vmatprep.subr.bf16.mxu0 %v2710_v0 }
 0xb09   :  { %2508 = vmatpush3.bf16.msra.mxu0 %v2796_v10 }
 0xb0a   :  { %2516 = vmatprep.subr.bf16.mxu0 %v2515_v14 }
 0xb0b   :  { %v1046_v25 = vld [vmem:[#allocation3 + $0x18] sm:$0xff] }
 0xbd7   :  { %v684_v40 = vpop.f32.mrb[10].mxu0 }
 0xbd8   :  { %v688_v41 = vadd.f32 %v684_v40, %v168_v39  ;;  %v2314_v42 = vpop.f32.mrb[11].mxu0 }
 0xbda   :  { %2614 = vtanh.f32 %v688_v41  ;;  %v2107_v44 = vmul.f32 -1.442695, %v688_v41 }
 0xbdc   :  { %2616 = vpow2.f32 %v2107_v44 }
 0xbe4   :  { %v2615_v43 = vpop.eup %2614 }
 0xbe5   :  { %698 = vrot.lane.b32.xlu0 %v2615_v43, %s2713_s23 }
 0xbe6   :  { %v2617_v45 = vpop.eup %2616 }
 0xbe7   :  { %v692_v46 = vadd.f32 1.0, %v2617_v45 }
 0xbe9   :  { %2618 = vrcp.f32 %v692_v46 }
 0xbf3   :  { %v2619_v47 = vpop.eup %2618 }
 0xbf4   :  { %v696_v50 = vmul.f32 %v2619_v47, %v601_v34 }
 0xc57   :  { %v699_v48 = vpop.permute.xlu0 %698 }
 0xc58   :  { %v701_v49 = vmul.f32 %v2619_v47, %v699_v48  ;;  %v1038_v48 = vld [vmem:[%s3129_s5] sm:$0xff] }
 0xc5a   :  { %703 = vrot.lane.b32.xlu1 %v701_v49, %s2714_s3  ;;  %v1039_v49 = vld [vmem:[%s3129_s5 + $0x8] sm:$0xff] }
 0xccc   :  { %v704_v51 = vpop.permute.xlu1 %703 }
 0xccd   :  { %v706_v52 = vadd.f32 %v704_v51, %v696_v50  ;;  %v2968_v50 = vpack.c.bf16 %v1039_v49, %v1038_v48  ;;  %v1040_v51 = vld [vmem:[%s3129_s5 + $0x10] sm:$0xff] }
 0xccf   :  { %2620 = vtanh.f32 %v706_v52 }
 0xcd9   :  { %v2621_v53 = vpop.eup %2620 }
 0xcda   :  { %709 = vrot.lane.b32.xlu0 %v2621_v53, %s2713_s23 }
 0xd4c   :  { %v710_v54 = vpop.permute.xlu0 %709 }
 0xd4d   :  { %v712_v55 = vmul.f32 %v2619_v47, %v710_v54 }
 0xd4f   :  { %714 = vrot.lane.b32.xlu1 %v712_v55, %s2714_s3 }
 0xdc1   :  { %v715_v56 = vpop.permute.xlu1 %714 }
 0xdc2   :  { %718 = vst.msk [vmem:[#allocation3 + $0x20] sm:$0xff] %vm195_vm3, %v715_v56  ;;  %2324 = vmatmul.mubr.msk.f32.vlgmr.msra.gmra.mrb[6].mxu1 %vm195_vm3, %v715_v56 }
 0xdc3   :  { %2511 = vmatpush3.bf16.msra.mxu1 %v2775_v4  ;;  %2345 = vmatprep.mubr.msk.f32.mxu1 %vm2711_vm2, %v2712_v8 }
 0xdc4   :  { %2512 = vmatprep.subr.bf16.mxu1 %v2710_v0 }
 0xdc7   :  { %2514 = vmatpush3.bf16.msra.mxu1 %v2796_v10 }
 0xdc8   :  { %2523 = vmatprep.subr.bf16.mxu1 %v2710_v0 }
 0xdc9   :  { %v1047_v26 = vld [vmem:[#allocation3 + $0x20] sm:$0xff] }
 0xe95   :  { %v789_v61 = vpop.f32.mrb[6].mxu1 }
 0xe96   :  { %v793_v62 = vadd.f32 %v789_v61, %v173_v58  ;;  %v2325_v63 = vpop.f32.mrb[7].mxu1  ;;  %v183_v61 = vadd.f32 %v2866_v59, %v2816_v12 }
 0xe98   :  { %2622 = vtanh.f32 %v793_v62  ;;  %v2109_v4 = vmul.f32 -1.442695, %v793_v62 }
 0xe9a   :  { %2624 = vpow2.f32 %v2109_v4  ;;  %v3004_v4 = vld [vmem:[%s3130_s6] ss:$0 sm:$0xff] }
 0xea2   :  { %v2623_v1 = vpop.eup %2622 }
 0xea3   :  { %803 = vrot.lane.b32.xlu0 %v2623_v1, %s2713_s23 }
 0xea4   :  { %v2625_v2 = vpop.eup %2624 }
 0xea5   :  { %v797_v3 = vadd.f32 1.0, %v2625_v2 }
 0xea7   :  { %2626 = vrcp.f32 %v797_v3 }
 0xeb1   :  { %v2627_v5 = vpop.eup %2626 }
 0xeb2   :  { %v801_v7 = vmul.f32 %v2627_v5, %v706_v52  ;;  %v1041_v52 = vld [vmem:[%s3129_s5 + $0x18] sm:$0xff] }
 0xeb3   :  { %v2978_v53 = vpack.c.bf16 %v1041_v52, %v1040_v51 }
 0xf15   :  { %v804_v6 = vpop.permute.xlu0 %803 }
 0xf16   :  { %v806_v10 = vmul.f32 %v2627_v5, %v804_v6 }
 0xf18   :  { %808 = vrot.lane.b32.xlu1 %v806_v10, %s2714_s3 }
 0xf8a   :  { %v809_v9 = vpop.permute.xlu1 %808 }
 0xf8b   :  { %v811_v57 = vadd.f32 %v809_v9, %v801_v7 }
 0xf8d   :  { %2628 = vtanh.f32 %v811_v57 }
 0xf97   :  { %v2629_v15 = vpop.eup %2628 }
 0xf98   :  { %814 = vrot.lane.b32.xlu0 %v2629_v15, %s2713_s23 }
0x100a   :  { %v815_v16 = vpop.permute.xlu0 %814 }
0x100b   :  { %v817_v17 = vmul.f32 %v2627_v5, %v815_v16 }
0x100d   :  { %819 = vrot.lane.b32.xlu1 %v817_v17, %s2714_s3 }
0x107f   :  { %v820_v21 = vpop.permute.xlu1 %819 }
0x1080   :  { %823 = vst.msk [vmem:[#allocation3 + $0x28] sm:$0xff] %vm195_vm3, %v820_v21  ;;  %2335 = vmatmul.mubr.msk.f32.vlgmr.msra.gmra.mrb[12].mxu0 %vm195_vm3, %v820_v21 }
0x1081   :  { %2518 = vmatpush3.bf16.msra.mxu0 %v2515_v14  ;;  %2356 = vmatprep.mubr.msk.f32.mxu0 %vm195_vm3, %v1043_v22 }
0x1082   :  { %2520 = vmatprep.subr.bf16.mxu0 %v2519_v20 }
0x1085   :  { %2522 = vmatpush3.bf16.msra.mxu0 %v2519_v20 }
0x1086   :  { %2535 = vmatprep.subr.bf16.mxu0 %v2710_v0 }
0x1087   :  { %v1048_v27 = vld [vmem:[#allocation3 + $0x28] sm:$0xff] }
0x1088   :  { %2357 = vmatmul.mubr.msk.f32.vlgmr.msra.gmra.mrb[14].mxu0 %vm195_vm3, %v1044_v23 }
0x1089   :  { %2359 = vmatprep.mubr.msk.f32.mxu0 %vm195_vm3, %v1045_v24  ;;  %2537 = vmatpush3.bf16.msra.mxu0 %v2968_v50 }
0x108a   :  { %2538 = vmatprep.subr.bf16.mxu0 %v2710_v0 }
0x108c   :  { %2360 = vmatmul.mubr.msk.f32.gmra.mrb[16].mxu0 %vm195_vm3, %v1046_v25 }
0x108d   :  { %2362 = vmatprep.mubr.msk.f32.mxu0 %vm195_vm3, %v1047_v26  ;;  %2540 = vmatpush3.bf16.msra.mxu0 %v2978_v53 }
0x108e   :  { %2547 = vmatprep.subr.bf16.mxu0 %v2710_v0 }
0x1090   :  { %2363 = vmatmul.mubr.msk.f32.gmra.mrb[18].mxu0 %vm195_vm3, %v1048_v27 }
0x1153   :  { %v894_v29 = vpop.f32.mrb[12].mxu0 }
0x1154   :  { %v898_v30 = vadd.f32 %v894_v29, %v178_v28  ;;  %v2336_v31 = vpop.f32.mrb[13].mxu0 }
0x1156   :  { %2630 = vtanh.f32 %v898_v30  ;;  %v2111_v39 = vmul.f32 -1.442695, %v898_v30 }
0x1158   :  { %2632 = vpow2.f32 %v2111_v39 }
0x115b   :  { %v2946_v32 = vpop.f32.mrb[14].mxu0 }
0x115c   :  { %v1147_v33 = vpop.f32.mrb[15].mxu0 }
0x115d   :  { %v1148_v2 = vadd.f32 %v3004_v4, %v1147_v33 }
0x115f   :  { %v2948_v34 = vpop.f32.mrb[16].mxu0 }
0x1160   :  { %v2631_v35 = vpop.eup %2630  ;;  %v2950_v36 = vpop.f32.mrb[17].mxu0 }
0x1161   :  { %908 = vrot.lane.b32.xlu0 %v2631_v35, %s2713_s23  ;;  %v1153_v35 = vadd.f32 %v2946_v32, %v3004_v4 }
0x1162   :  { %v2633_v60 = vpop.eup %2632 }
0x1163   :  { %v2953_v37 = vpop.f32.mrb[18].mxu0  ;;  %v902_v40 = vadd.f32 1.0, %v2633_v60 }
0x1164   :  { %v2955_v38 = vpop.f32.mrb[19].mxu0 }
0x1165   :  { %2634 = vrcp.f32 %v902_v40 }
0x116f   :  { %v2635_v41 = vpop.eup %2634 }
0x1170   :  { %v906_v44 = vmul.f32 %v2635_v41, %v811_v57 }
0x11d3   :  { %v909_v42 = vpop.permute.xlu0 %908 }
0x11d4   :  { %v911_v43 = vmul.f32 %v2635_v41, %v909_v42 }
0x11d6   :  { %913 = vrot.lane.b32.xlu1 %v911_v43, %s2714_s3 }
0x1248   :  { %v914_v45 = vpop.permute.xlu1 %913 }
0x1249   :  { %v2958_v46 = vadd.f32 %v914_v45, %v906_v44 }
0x124b   :  { %2636 = vtanh.f32 %v2958_v46 }
0x1255   :  { %v2637_v47 = vpop.eup %2636 }
0x1256   :  { %919 = vrot.lane.b32.xlu0 %v2637_v47, %s2713_s23 }
0x12c8   :  { %v920_v54 = vpop.permute.xlu0 %919 }
0x12c9   :  { %v922_v55 = vmul.f32 %v2635_v41, %v920_v54 }
0x12cb   :  { %924 = vrot.lane.b32.xlu1 %v922_v55, %s2714_s3 }
0x133d   :  { %v925_v56 = vpop.permute.xlu1 %924 }
0x133e   :  { %928 = vst.msk [vmem:[#allocation3 + $0x30] sm:$0xff] %vm195_vm3, %v925_v56  ;;  %2346 = vmatmul.mubr.msk.f32.vlgmr.msra.gmra.mrb[8].mxu1 %vm195_vm3, %v925_v56 }
0x133f   :  { %2525 = vmatpush3.bf16.msra.mxu1 %v2968_v50  ;;  %2376 = vmatprep.mubr.msk.f32.mxu1 %vm2711_vm2, %v2712_v8 }
0x1340   :  { %2526 = vmatprep.subr.bf16.mxu1 %v2710_v0 }
0x1343   :  { %2528 = vmatpush3.bf16.msra.mxu1 %v2978_v53 }
0x1344   :  { %2529 = vmatprep.subr.bf16.mxu1 %v2710_v0 }
0x1345   :  { %v1049_v58 = vld [vmem:[#allocation3 + $0x30] sm:$0xff] }
0x1346   :  { %2377 = vmatmul.mubr.f32.vlgmr.msra.gmra.mrb[10].mxu1 %v2712_v8  ;;  %2365 = vmatprep.mubr.msk.f32.mxu0 %vm195_vm3, %v1049_v58 }
0x1347   :  { %2531 = vmatpush3.bf16.msra.mxu1 %v2968_v50  ;;  %2387 = vmatprep.mubr.msk.f32.mxu1 %vm2711_vm2, %v2712_v8 }
0x1348   :  { %2532 = vmatprep.subr.bf16.mxu1 %v2710_v0 }
0x134b   :  { %2534 = vmatpush3.bf16.msra.mxu1 %v2978_v53 }
0x134c   :  { %2541 = vmatprep.subr.bf16.mxu1 %v2710_v0 }
0x1411   :  { %v999_v62 = vpop.f32.mrb[8].mxu1 }
0x1412   :  { %v1003_v63 = vadd.f32 %v999_v62, %v183_v61  ;;  %v2347_v1 = vpop.f32.mrb[9].mxu1 }
0x1414   :  { %v2113_v18 = vmul.f32 -1.442695, %v1003_v63 }
0x1419   :  { %v1261_v3 = vpop.f32.mrb[10].mxu1 }
0x141a   :  { %v1265_v5 = vadd.f32 %v1261_v3, %v1148_v2  ;;  %v2378_v6 = vpop.f32.mrb[11].mxu1 }
0x141c   :  { %2638 = vtanh.f32 %v1265_v5  ;;  %v2123_v7 = vmul.f32 -1.442695, %v1265_v5 }
0x141e   :  { %2640 = vpow2.f32 %v2123_v7 }
0x1426   :  { %v2639_v10 = vpop.eup %2638 }
0x1427   :  { %1275 = vrot.lane.b32.xlu0 %v2639_v10, %s2713_s23 }
0x1428   :  { %v2641_v12 = vpop.eup %2640 }
0x1429   :  { %v1269_v59 = vadd.f32 1.0, %v2641_v12 }
0x142b   :  { %2642 = vrcp.f32 %v1269_v59 }
0x1435   :  { %v2643_v9 = vpop.eup %2642 }
0x1436   :  { %v1273_v13 = vmul.f32 0.0, %v2643_v9 }
0x1499   :  { %v1276_v57 = vpop.permute.xlu0 %1275 }
0x149a   :  { %v1278_v11 = vmul.f32 %v2643_v9, %v1276_v57 }
0x149c   :  { %1280 = vrot.lane.b32.xlu1 %v1278_v11, %s2714_s3 }
0x150e   :  { %v1281_v14 = vpop.permute.xlu1 %1280 }
0x150f   :  { %v1283_v15 = vadd.f32 %v1281_v14, %v1273_v13 }
0x1511   :  { %2644 = vtanh.f32 %v1283_v15 }
0x1512   :  { %2646 = vtanh.f32 %v1003_v63  ;;  %v1158_v63 = vadd.f32 %v3004_v4, %v2950_v36 }
0x1513   :  { %2648 = vpow2.f32 %v2113_v18 }
0x151b   :  { %v2645_v16 = vpop.eup %2644 }
0x151c   :  { %1286 = vrot.lane.b32.xlu0 %v2645_v16, %s2713_s23  ;;  %v2647_v17 = vpop.eup %2646 }
0x151d   :  { %v2649_v19 = vpop.eup %2648 }
0x151e   :  { %v1007_v20 = vadd.f32 1.0, %v2649_v19 }
0x1520   :  { %1013 = vrot.lane.b32.xlu0 %v2647_v17, %s2713_s23  ;;  %2650 = vrcp.f32 %v1007_v20  ;;  %v1163_v17 = vadd.f32 %v2948_v34, %v3004_v4 }
0x152a   :  { %v2651_v23 = vpop.eup %2650 }
0x152b   :  { %v1011_v27 = vmul.f32 %v2651_v23, %v2958_v46 }
0x158e   :  { %v1287_v21 = vpop.permute.xlu0 %1286 }
0x158f   :  { %v1289_v22 = vmul.f32 %v2643_v9, %v1287_v21 }
0x1591   :  { %1292 = vrot.lane.b32.xlu1 %v1289_v22, %s2714_s3 }
0x1592   :  { %v1014_v24 = vpop.permute.xlu0 %1013 }
0x1593   :  { %v1016_v25 = vmul.f32 %v2651_v23, %v1014_v24 }
0x1595   :  { %1018 = vrot.lane.b32.xlu0 %v1016_v25, %s2714_s3 }
0x1603   :  { %v1293_v26 = vpop.permute.xlu1 %1292 }
0x1604   :  { %2388 = vmatmul.mubr.msk.f32.vlgmr.msra.gmra.mrb[12].mxu1 %vm195_vm3, %v1293_v26 }
0x1605   :  { %2543 = vmatpush3.bf16.msra.mxu1 %v2968_v50  ;;  %2409 = vmatprep.mubr.msk.f32.mxu1 %vm2711_vm2, %v2712_v8 }
0x1606   :  { %2544 = vmatprep.subr.bf16.mxu1 %v2710_v0 }
0x1607   :  { %v1019_v28 = vpop.permute.xlu0 %1018 }
0x1608   :  { %v1021_v29 = vadd.f32 %v1019_v28, %v1011_v27 }
0x1609   :  { %2546 = vmatpush3.bf16.msra.mxu1 %v2978_v53 }
0x160a   :  { %2652 = vtanh.f32 %v1021_v29  ;;  %2553 = vmatprep.subr.bf16.mxu1 %v2710_v0 }
0x1614   :  { %v2653_v30 = vpop.eup %2652 }
0x1615   :  { %1024 = vrot.lane.b32.xlu0 %v2653_v30, %s2713_s23 }
0x1687   :  { %v1025_v31 = vpop.permute.xlu0 %1024 }
0x1688   :  { %v1027_v33 = vmul.f32 %v2651_v23, %v1025_v31 }
0x168a   :  { %1029 = vrot.lane.b32.xlu0 %v1027_v33, %s2714_s3 }
0x16d7   :  { %v1362_v39 = vpop.f32.mrb[12].mxu1 }
0x16d8   :  { %v1366_v60 = vadd.f32 %v1362_v39, %v1153_v35  ;;  %v2389_v40 = vpop.f32.mrb[13].mxu1  ;;  %v1168_v39 = vadd.f32 %v3004_v4, %v2955_v38 }
0x16da   :  { %2654 = vtanh.f32 %v1366_v60  ;;  %v2125_v44 = vmul.f32 -1.442695, %v1366_v60 }
0x16dc   :  { %2656 = vpow2.f32 %v2125_v44 }
0x16e4   :  { %v2655_v41 = vpop.eup %2654 }
0x16e5   :  { %1376 = vrot.lane.b32.xlu1 %v2655_v41, %s2713_s23 }
0x16e6   :  { %v2657_v45 = vpop.eup %2656 }
0x16e7   :  { %v1370_v32 = vadd.f32 1.0, %v2657_v45 }
0x16e9   :  { %2658 = vrcp.f32 %v1370_v32 }
0x16f3   :  { %v2659_v46 = vpop.eup %2658 }
0x16f4   :  { %v1374_v49 = vmul.f32 %v2659_v46, %v1283_v15 }
0x16fc   :  { %v1030_v42 = vpop.permute.xlu0 %1029 }
0x16fd   :  { %1033 = vst.msk [vmem:[#allocation3 + $0x38] sm:$0xff] %vm195_vm3, %v1030_v42 }
0x1704   :  { %v1050_v43 = vld [vmem:[#allocation3 + $0x38] sm:$0xff] }
0x1705   :  { %2366 = vmatmul.mubr.msk.f32.gmra.mrb[20].mxu0 %vm195_vm3, %v1050_v43 }
0x1706   :  { %2398 = vmatprep.mubr.msk.f32.mxu0 %vm2711_vm2, %v2712_v8 }
0x1757   :  { %v1377_v47 = vpop.permute.xlu1 %1376 }
0x1758   :  { %v1379_v48 = vmul.f32 %v2659_v46, %v1377_v47 }
0x175a   :  { %1381 = vrot.lane.b32.xlu1 %v1379_v48, %s2714_s3 }
0x17cc   :  { %v1382_v51 = vpop.permute.xlu1 %1381 }
0x17cd   :  { %v1384_v52 = vadd.f32 %v1382_v51, %v1374_v49 }
0x17cf   :  { %2660 = vtanh.f32 %v1384_v52 }
0x17d8   :  { %v3031_v54 = vpop.f32.mrb[20].mxu0 }
0x17d9   :  { %v2661_v55 = vpop.eup %2660  ;;  %v3033_v56 = vpop.f32.mrb[21].mxu0 }
0x17da   :  { %1387 = vrot.lane.b32.xlu1 %v2661_v55, %s2713_s23 }
0x184c   :  { %v1388_v58 = vpop.permute.xlu1 %1387 }
0x184d   :  { %v1390_v61 = vmul.f32 %v2659_v46, %v1388_v58 }
0x184f   :  { %1393 = vrot.lane.b32.xlu1 %v1390_v61, %s2714_s3  ;;  %v1173_v61 = vadd.f32 %v2953_v37, %v3004_v4 }
0x18c1   :  { %v1394_v62 = vpop.permute.xlu1 %1393 }
0x18c2   :  { %2399 = vmatmul.mubr.msk.f32.vlgmr.msra.gmra.mrb[22].mxu0 %vm195_vm3, %v1394_v62 }
0x18c3   :  { %2549 = vmatpush3.bf16.msra.mxu0 %v2968_v50  ;;  %2420 = vmatprep.mubr.msk.f32.mxu0 %vm2711_vm2, %v2712_v8 }
0x18c4   :  { %2550 = vmatprep.subr.bf16.mxu0 %v2710_v0 }
0x18c7   :  { %2552 = vmatpush3.bf16.msra.mxu0 %v2978_v53 }
0x18c8   :  { %2559 = vmatprep.subr.bf16.mxu0 %v2710_v0 }
0x1995   :  { %v1463_v1 = vpop.f32.mrb[22].mxu0 }
0x1996   :  { %v1467_v2 = vadd.f32 %v1463_v1, %v1158_v63  ;;  %v2400_v3 = vpop.f32.mrb[23].mxu0 }
0x1998   :  { %2662 = vtanh.f32 %v1467_v2  ;;  %v2127_v6 = vmul.f32 -1.442695, %v1467_v2 }
0x199a   :  { %2664 = vpow2.f32 %v2127_v6 }
0x19a2   :  { %v2663_v5 = vpop.eup %2662 }
0x19a3   :  { %1477 = vrot.lane.b32.xlu0 %v2663_v5, %s2713_s23 }
0x19a4   :  { %v2665_v10 = vpop.eup %2664 }
0x19a5   :  { %v1471_v7 = vadd.f32 1.0, %v2665_v10 }
0x19a7   :  { %2666 = vrcp.f32 %v1471_v7 }
0x19b1   :  { %v2667_v12 = vpop.eup %2666 }
0x19b2   :  { %v1475_v57 = vmul.f32 %v2667_v12, %v1384_v52 }
0x1a15   :  { %v1478_v59 = vpop.permute.xlu0 %1477 }
0x1a16   :  { %v1480_v9 = vmul.f32 %v2667_v12, %v1478_v59 }
0x1a18   :  { %1482 = vrot.lane.b32.xlu1 %v1480_v9, %s2714_s3 }
0x1a8a   :  { %v1483_v11 = vpop.permute.xlu1 %1482 }
0x1a8b   :  { %v1485_v36 = vadd.f32 %v1483_v11, %v1475_v57 }
0x1a8d   :  { %2668 = vtanh.f32 %v1485_v36 }
0x1a97   :  { %v2669_v13 = vpop.eup %2668 }
0x1a98   :  { %1488 = vrot.lane.b32.xlu0 %v2669_v13, %s2713_s23 }
0x1b0a   :  { %v1489_v14 = vpop.permute.xlu0 %1488 }
0x1b0b   :  { %v1491_v15 = vmul.f32 %v2667_v12, %v1489_v14 }
0x1b0d   :  { %1494 = vrot.lane.b32.xlu1 %v1491_v15, %s2714_s3 }
0x1b7f   :  { %v1495_v16 = vpop.permute.xlu1 %1494 }
0x1b80   :  { %2410 = vmatmul.mubr.msk.f32.vlgmr.msra.gmra.mrb[14].mxu1 %vm195_vm3, %v1495_v16 }
0x1b81   :  { %2555 = vmatpush3.bf16.msra.mxu1 %v2968_v50  ;;  %2431 = vmatprep.mubr.msk.f32.mxu1 %vm2711_vm2, %v2712_v8 }
0x1b82   :  { %2556 = vmatprep.subr.bf16.mxu1 %v2710_v0 }
0x1b85   :  { %2558 = vmatpush3.bf16.msra.mxu1 %v2978_v53 }
0x1b86   :  { %2565 = vmatprep.subr.bf16.mxu1 %v2710_v0 }
0x1c53   :  { %v1564_v18 = vpop.f32.mrb[14].mxu1 }
0x1c54   :  { %v1568_v19 = vadd.f32 %v1564_v18, %v1163_v17  ;;  %v2411_v20 = vpop.f32.mrb[15].mxu1 }
0x1c56   :  { %2670 = vtanh.f32 %v1568_v19  ;;  %v2129_v22 = vmul.f32 -1.442695, %v1568_v19 }
0x1c58   :  { %2672 = vpow2.f32 %v2129_v22 }
0x1c60   :  { %v2671_v21 = vpop.eup %2670 }
0x1c61   :  { %1578 = vrot.lane.b32.xlu0 %v2671_v21, %s2713_s23 }
0x1c62   :  { %v2673_v23 = vpop.eup %2672 }
0x1c63   :  { %v1572_v24 = vadd.f32 1.0, %v2673_v23 }
0x1c65   :  { %2674 = vrcp.f32 %v1572_v24 }
0x1c6f   :  { %v2675_v25 = vpop.eup %2674 }
0x1c70   :  { %v1576_v28 = vmul.f32 %v2675_v25, %v1485_v36  ;;  %v1178_v36 = vadd.f32 %v3004_v4, %v3033_v56 }
0x1cd3   :  { %v1579_v26 = vpop.permute.xlu0 %1578 }
0x1cd4   :  { %v1581_v27 = vmul.f32 %v2675_v25, %v1579_v26 }
0x1cd6   :  { %1583 = vrot.lane.b32.xlu1 %v1581_v27, %s2714_s3 }
0x1d48   :  { %v1584_v29 = vpop.permute.xlu1 %1583 }
0x1d49   :  { %v1586_v34 = vadd.f32 %v1584_v29, %v1576_v28  ;;  %v1183_v28 = vadd.f32 %v3031_v54, %v3004_v4  ;;  %v1997_v54 = vld [vmem:[%s3131_s7] sm:$0xff] }
0x1d4b   :  { %2676 = vtanh.f32 %v1586_v34 }
0x1d55   :  { %v2677_v30 = vpop.eup %2676 }
0x1d56   :  { %1589 = vrot.lane.b32.xlu0 %v2677_v30, %s2713_s23 }
0x1dc8   :  { %v1590_v31 = vpop.permute.xlu0 %1589 }
0x1dc9   :  { %v1592_v33 = vmul.f32 %v2675_v25, %v1590_v31 }
0x1dcb   :  { %1595 = vrot.lane.b32.xlu1 %v1592_v33, %s2714_s3 }
0x1e3d   :  { %v1596_v35 = vpop.permute.xlu1 %1595 }
0x1e3e   :  { %2421 = vmatmul.mubr.msk.f32.vlgmr.msra.gmra.mrb[24].mxu0 %vm195_vm3, %v1596_v35 }
0x1e3f   :  { %2561 = vmatpush3.bf16.msra.mxu0 %v2968_v50  ;;  %2442 = vmatprep.mubr.msk.f32.mxu0 %vm2711_vm2, %v2712_v8 }
0x1e40   :  { %2562 = vmatprep.subr.bf16.mxu0 %v2710_v0 }
0x1e43   :  { %2564 = vmatpush3.bf16.msra.mxu0 %v2978_v53 }
0x1e44   :  { %2571 = vmatprep.subr.bf16.mxu0 %v2710_v0 }
0x1f11   :  { %v1665_v60 = vpop.f32.mrb[24].mxu0 }
0x1f12   :  { %v1669_v40 = vadd.f32 %v1665_v60, %v1168_v39  ;;  %v2422_v41 = vpop.f32.mrb[25].mxu0 }
0x1f14   :  { %2678 = vtanh.f32 %v1669_v40  ;;  %v2131_v43 = vmul.f32 -1.442695, %v1669_v40 }
0x1f16   :  { %2680 = vpow2.f32 %v2131_v43 }
0x1f1e   :  { %v2679_v42 = vpop.eup %2678 }
0x1f1f   :  { %1679 = vrot.lane.b32.xlu0 %v2679_v42, %s2713_s23 }
0x1f20   :  { %v2681_v44 = vpop.eup %2680 }
0x1f21   :  { %v1673_v45 = vadd.f32 1.0, %v2681_v44  ;;  %v1998_v44 = vld [vmem:[%s3131_s7 + $0x8] sm:$0xff] }
0x1f23   :  { %2682 = vrcp.f32 %v1673_v45  ;;  %v1999_v45 = vld [vmem:[%s3131_s7 + $0x10] sm:$0xff] }
0x1f2d   :  { %v2683_v32 = vpop.eup %2682 }
0x1f2e   :  { %v1677_v48 = vmul.f32 %v2683_v32, %v1586_v34 }
0x1f91   :  { %v1680_v46 = vpop.permute.xlu0 %1679 }
0x1f92   :  { %v1682_v47 = vmul.f32 %v2683_v32, %v1680_v46  ;;  %v2000_v46 = vld [vmem:[%s3131_s7 + $0x18] sm:$0xff] }
0x1f94   :  { %1684 = vrot.lane.b32.xlu1 %v1682_v47, %s2714_s3  ;;  %v2575_v47 = vpack.c.bf16 %v2000_v46, %v1999_v45 }
0x2006   :  { %v1685_v49 = vpop.permute.xlu1 %1684 }
0x2007   :  { %v1687_v38 = vadd.f32 %v1685_v49, %v1677_v48 }
0x2009   :  { %2684 = vtanh.f32 %v1687_v38 }
0x2013   :  { %v2685_v51 = vpop.eup %2684 }
0x2014   :  { %1690 = vrot.lane.b32.xlu0 %v2685_v51, %s2713_s23 }
0x2086   :  { %v1691_v52 = vpop.permute.xlu0 %1690 }
0x2087   :  { %v1693_v55 = vmul.f32 %v2683_v32, %v1691_v52  ;;  %v2572_v32 = vpack.c.bf16 %v1998_v44, %v1997_v54  ;;  %v2138_v52 = vld [vmem:[%s3132_s8] ss:$0 sm:$0xff] }
0x2089   :  { %1696 = vrot.lane.b32.xlu1 %v1693_v55, %s2714_s3 }
0x20fb   :  { %v1697_v58 = vpop.permute.xlu1 %1696 }
0x20fc   :  { %2432 = vmatmul.mubr.msk.f32.vlgmr.msra.gmra.mrb[16].mxu1 %vm195_vm3, %v1697_v58 }
0x20fd   :  { %2567 = vmatpush3.bf16.msra.mxu1 %v2968_v50  ;;  %2453 = vmatprep.mubr.msk.f32.mxu1 %vm2711_vm2, %v2712_v8 }
0x20fe   :  { %2568 = vmatprep.subr.bf16.mxu1 %v2710_v0 }
0x2101   :  { %2570 = vmatpush3.bf16.msra.mxu1 %v2978_v53 }
0x21cf   :  { %v1766_v62 = vpop.f32.mrb[16].mxu1 }
0x21d0   :  { %v1770_v63 = vadd.f32 %v1766_v62, %v1173_v61  ;;  %v2433_v1 = vpop.f32.mrb[17].mxu1 }
0x21d2   :  { %2686 = vtanh.f32 %v1770_v63  ;;  %v2133_v3 = vmul.f32 -1.442695, %v1770_v63 }
0x21d4   :  { %2688 = vpow2.f32 %v2133_v3 }
0x21dc   :  { %v2687_v2 = vpop.eup %2686 }
0x21dd   :  { %1780 = vrot.lane.b32.xlu0 %v2687_v2, %s2713_s23 }
0x21de   :  { %v2689_v50 = vpop.eup %2688 }
0x21df   :  { %v1774_v5 = vadd.f32 1.0, %v2689_v50 }
0x21e1   :  { %2690 = vrcp.f32 %v1774_v5 }
0x21eb   :  { %v2691_v6 = vpop.eup %2690 }
0x21ec   :  { %v1778_v53 = vmul.f32 %v2691_v6, %v1687_v38 }
0x224f   :  { %v1781_v10 = vpop.permute.xlu0 %1780 }
0x2250   :  { %v1783_v7 = vmul.f32 %v2691_v6, %v1781_v10 }
0x2252   :  { %1785 = vrot.lane.b32.xlu1 %v1783_v7, %s2714_s3 }
0x22c4   :  { %v1786_v12 = vpop.permute.xlu1 %1785 }
0x22c5   :  { %v1788_v37 = vadd.f32 %v1786_v12, %v1778_v53 }
0x22c7   :  { %2692 = vtanh.f32 %v1788_v37 }
0x22d1   :  { %v2693_v59 = vpop.eup %2692 }
0x22d2   :  { %1791 = vrot.lane.b32.xlu0 %v2693_v59, %s2713_s23 }
0x2344   :  { %v1792_v9 = vpop.permute.xlu0 %1791 }
0x2345   :  { %v1794_v57 = vmul.f32 %v2691_v6, %v1792_v9 }
0x2347   :  { %1797 = vrot.lane.b32.xlu1 %v1794_v57, %s2714_s3 }
0x23b9   :  { %v1798_v11 = vpop.permute.xlu1 %1797 }
0x23ba   :  { %2443 = vmatmul.mubr.msk.f32.vlgmr.msra.gmra.mrb[26].mxu0 %vm195_vm3, %v1798_v11 }
0x23bb   :  { %2464 = vmatprep.mubr.msk.f32.mxu0 %vm2711_vm2, %v2712_v8  ;;  %2573 = vmatpush3.bf16.msra.mxu0 %v2572_v32 }
0x23bc   :  { %2574 = vmatprep.subr.bf16.mxu0 %v2710_v0 }
0x23bf   :  { %2576 = vmatpush3.bf16.msra.mxu0 %v2575_v47 }
0x248d   :  { %v1867_v13 = vpop.f32.mrb[26].mxu0 }
0x248e   :  { %v1871_v14 = vadd.f32 %v1867_v13, %v1178_v36  ;;  %v2444_v15 = vpop.f32.mrb[27].mxu0 }
0x2490   :  { %2694 = vtanh.f32 %v1871_v14  ;;  %v2135_v17 = vmul.f32 -1.442695, %v1871_v14 }
0x2492   :  { %2696 = vpow2.f32 %v2135_v17 }
0x249a   :  { %v2695_v16 = vpop.eup %2694 }
0x249b   :  { %1881 = vrot.lane.b32.xlu0 %v2695_v16, %s2713_s23 }
0x249c   :  { %v2697_v18 = vpop.eup %2696 }
0x249d   :  { %v1875_v19 = vadd.f32 1.0, %v2697_v18 }
0x249f   :  { %2698 = vrcp.f32 %v1875_v19 }
0x24a9   :  { %v2699_v20 = vpop.eup %2698 }
0x24aa   :  { %v1879_v8 = vmul.f32 %v2699_v20, %v1788_v37 }
0x250d   :  { %v1882_v21 = vpop.permute.xlu0 %1881 }
0x250e   :  { %v1884_v22 = vmul.f32 %v2699_v20, %v1882_v21 }
0x2510   :  { %1886 = vrot.lane.b32.xlu1 %v1884_v22, %s2714_s3 }
0x2582   :  { %v1887_v23 = vpop.permute.xlu1 %1886 }
0x2583   :  { %v1889_v56 = vadd.f32 %v1887_v23, %v1879_v8 }
0x2585   :  { %2700 = vtanh.f32 %v1889_v56 }
0x258f   :  { %v2701_v24 = vpop.eup %2700 }
0x2590   :  { %1892 = vrot.lane.b32.xlu0 %v2701_v24, %s2713_s23 }
0x2602   :  { %v1893_v25 = vpop.permute.xlu0 %1892 }
0x2603   :  { %v1895_v26 = vmul.f32 %v2699_v20, %v1893_v25 }
0x2605   :  { %1898 = vrot.lane.b32.xlu1 %v1895_v26, %s2714_s3 }
0x2677   :  { %v1899_v27 = vpop.permute.xlu1 %1898 }
0x2678   :  { %2454 = vmatmul.mubr.msk.f32.vlgmr.msra.gmra.mrb[18].mxu1 %vm195_vm3, %v1899_v27 }
0x274b   :  { %v1968_v29 = vpop.f32.mrb[18].mxu1 }
0x274c   :  { %v1972_v34 = vadd.f32 %v1968_v29, %v1183_v28  ;;  %v2455_v30 = vpop.f32.mrb[19].mxu1 }
0x274e   :  { %2702 = vtanh.f32 %v1972_v34  ;;  %v2137_v33 = vmul.f32 -1.442695, %v1972_v34 }
0x2750   :  { %2704 = vpow2.f32 %v2137_v33 }
0x2758   :  { %v2703_v31 = vpop.eup %2702 }
0x2759   :  { %1982 = vrot.lane.b32.xlu0 %v2703_v31, %s2713_s23 }
0x275a   :  { %v2705_v35 = vpop.eup %2704 }
0x275b   :  { %v1976_v39 = vadd.f32 1.0, %v2705_v35 }
0x275d   :  { %2706 = vrcp.f32 %v1976_v39 }
0x2767   :  { %v2707_v60 = vpop.eup %2706 }
0x2768   :  { %v1980_v42 = vmul.f32 %v2707_v60, %v1889_v56 }
0x27cb   :  { %v1983_v40 = vpop.permute.xlu0 %1982 }
0x27cc   :  { %v1985_v41 = vmul.f32 %v2707_v60, %v1983_v40 }
0x27ce   :  { %1987 = vrot.lane.b32.xlu1 %v1985_v41, %s2714_s3 }
0x2840   :  { %v1988_v43 = vpop.permute.xlu1 %1987 }
0x2841   :  { %v1990_v4 = vadd.f32 %v1988_v43, %v1980_v42 }
0x2843   :  { %2708 = vtanh.f32 %v1990_v4 }
0x284d   :  { %v2709_v48 = vpop.eup %2708 }
0x284e   :  { %1993 = vrot.lane.b32.xlu0 %v2709_v48, %s2713_s23 }
0x28c0   :  { %v1994_v49 = vpop.permute.xlu0 %1993 }
0x28c1   :  { %v1996_v38 = vmul.f32 %v2707_v60, %v1994_v49 }
0x28c3   :  { %2009 = vrot.lane.b32.xlu1 %v1996_v38, %s2714_s3 }
0x2935   :  { %v2010_v51 = vpop.permute.xlu1 %2009 }
0x2936   :  { %2465 = vmatmul.mubr.msk.f32.vlgmr.msra.gmra.mrb[28].mxu0 %vm195_vm3, %v2010_v51 }
0x2a09   :  { %v2079_v55 = vpop.f32.mrb[28].mxu0 }
0x2a0a   :  { %v2080_v58 = vadd.f32 %v2138_v52, %v2079_v55  ;;  %v2466_v61 = vpop.f32.mrb[29].mxu0 }
0x2a0c   :  { %2084 = vst.msk [vmem:[%s3133_s9] sm:$0xff] %vm2083_vm4, %v2080_v58 }

</bundles_post_ra>
